<compile_context>
chip_gen: v6e
topology: v6e:2x2x1
jax: 0.10.0
libtpu: 0.0.40
codegen_flags: <defaults>
</compile_context>

<pallas_src>
import math

import jax
import jax.numpy as jnp
from jax.experimental import pallas as pl
from jax.experimental.pallas import tpu as pltpu

IMAGE_SIZE = (1, 28, 28)
IN_DIM = int(math.prod(IMAGE_SIZE))            # 784
IN_DIM_PAD = 896                               # 7 * 128
LAYER_DIMS = [IN_DIM, 512, 256, 128, 64, 32, 1]
N_LAYERS = len(LAYER_DIMS) - 1


def _gelu_exact(x):
    # torch.nn.GELU() default is the exact (erf-based) GELU.
    return 0.5 * x * (1.0 + jax.lax.erf(x * (1.0 / math.sqrt(2.0))))


def _disc_kernel(x_ref, *refs):
    """refs = (w1, b1, ..., w6, b6, o_ref)."""
    o_ref = refs[-1]
    wb = refs[:-1]

    h = x_ref[...]                                             # (TB, 896) bf16
    for layer in range(N_LAYERS):
        w = wb[2 * layer]                                      # bf16 (K, N)
        b = wb[2 * layer + 1]                                  # f32  (1, N)
        acc = jnp.dot(h, w[...],
                      preferred_element_type=jnp.float32) + b[...]   # f32
        if layer < N_LAYERS - 1:
            h = _gelu_exact(acc).astype(jnp.bfloat16)
        else:
            o_ref[...] = jax.nn.sigmoid(acc)                   # (TB, 1) f32


def init_params(key):
    """Deterministic init mimicking nn.Linear default (uniform(+-1/sqrt(fan_in)))."""
    params = []
    for fan_in, fan_out in zip(LAYER_DIMS[:-1], LAYER_DIMS[1:]):
        key, kw, kb = jax.random.split(key, 3)
        bound = 1.0 / math.sqrt(fan_in)
        w = jax.random.uniform(kw, (fan_in, fan_out), jnp.float32, -bound, bound)
        b = jax.random.uniform(kb, (1, fan_out), jnp.float32, -bound, bound)
        params.append((w, b))
    return params


def _round_up(x, m):
    return ((x + m - 1) // m) * m


def discriminator_forward(image, params, *, tb=256):
    """image: (B, 1, 28, 28) f32 (NCHW) -> prob: (B, 1) f32."""
    batch = image.shape[0]

    # Flatten, zero-pad feature axis to 896, cast to bf16 (halves HBM read).
    x2d = image.reshape(batch, -1).astype(jnp.float32)
    x2d = jnp.pad(x2d, ((0, 0), (0, IN_DIM_PAD - IN_DIM))).astype(jnp.bfloat16)

    # Batch tiling: TB rows per grid step, pad batch to a multiple of TB.
    tb = min(tb, _round_up(batch, 8))
    bp = _round_up(batch, tb)
    if bp != batch:
        x2d = jnp.pad(x2d, ((0, bp - batch), (0, 0)))

    flat_params = []
    in_specs = [pl.BlockSpec((tb, IN_DIM_PAD), lambda i: (i, 0))]
    for layer, (w, b) in enumerate(params):
        if layer == 0:
            # zero rows match the zero-padded input columns -> identical math
            w = jnp.pad(w, ((0, IN_DIM_PAD - IN_DIM), (0, 0)))
        w = w.astype(jnp.bfloat16)
        b = b.astype(jnp.float32)
        flat_params.extend([w, b])
        # Constant index_map -> weights/biases stay resident, no re-DMA per step.
        in_specs.append(pl.BlockSpec(w.shape, lambda i: (0, 0)))
        in_specs.append(pl.BlockSpec(b.shape, lambda i: (0, 0)))

    out = pl.pallas_call(
        _disc_kernel,
        out_shape=jax.ShapeDtypeStruct((bp, 1), jnp.float32),
        grid=(bp // tb,),
        in_specs=in_specs,
        out_specs=pl.BlockSpec((tb, 1), lambda i: (i, 0)),
        compiler_params=pltpu.CompilerParams(
            dimension_semantics=("parallel",)),
    )(x2d, *flat_params)

    return out[:batch]


def _reference_forward(image, params, *, bf16_matmul=True):
    """Pure-JAX reference; bf16_matmul=True mirrors the kernel's precision."""
    x = image.reshape(image.shape[0], -1).astype(jnp.float32)
    for i, (w, b) in enumerate(params):
        if bf16_matmul:
            y = jnp.dot(x.astype(jnp.bfloat16), w.astype(jnp.bfloat16),
                        preferred_element_type=jnp.float32) + b
        else:
            y = x @ w + b
        x = _gelu_exact(y) if i < len(params) - 1 else y
    return jax.nn.sigmoid(x)


if __name__ == "__main__":
    key = jax.random.PRNGKey(0)
    k_img, k_par = jax.random.split(key)

    batch = 2
    image = jax.random.normal(k_img, (batch, *IMAGE_SIZE), jnp.float32)  # NCHW
    params = init_params(k_par)

    prob = discriminator_forward(image, params)
    prob = jax.block_until_ready(prob)
    assert prob.shape == (batch, 1)

    # Tight check against a reference with matching bf16 matmul precision.
    ref_bf16 = _reference_forward(image, params, bf16_matmul=True)
    assert jnp.allclose(prob, ref_bf16, atol=2e-3, rtol=2e-3), (prob, ref_bf16)

    # Loose check against the full-f32 reference (bf16 operands shift numerics).
    ref_f32 = _reference_forward(image, params, bf16_matmul=False)
    assert jnp.allclose(prob, ref_f32, atol=3e-2, rtol=3e-2), (prob, ref_f32)

    print("KERNEL_OK")
</pallas_src>

<mosaic_0001>
module attributes {stable_mosaic.version = 11 : i64} {
  func.func @_disc_kernel(%arg0: i32, %arg1: memref<8x896xbf16, #tpu.memory_space<vmem>>, %arg2: memref<896x512xbf16, #tpu.memory_space<vmem>>, %arg3: memref<1x512xf32, #tpu.memory_space<vmem>>, %arg4: memref<512x256xbf16, #tpu.memory_space<vmem>>, %arg5: memref<1x256xf32, #tpu.memory_space<vmem>>, %arg6: memref<256x128xbf16, #tpu.memory_space<vmem>>, %arg7: memref<1x128xf32, #tpu.memory_space<vmem>>, %arg8: memref<128x64xbf16, #tpu.memory_space<vmem>>, %arg9: memref<1x64xf32, #tpu.memory_space<vmem>>, %arg10: memref<64x32xbf16, #tpu.memory_space<vmem>>, %arg11: memref<1x32xf32, #tpu.memory_space<vmem>>, %arg12: memref<32x1xbf16, #tpu.memory_space<vmem>>, %arg13: memref<1x1xf32, #tpu.memory_space<vmem>>, %arg14: memref<8x1xf32, #tpu.memory_space<vmem>>) attributes {dimension_semantics = [#tpu.dimension_semantics<parallel>], iteration_bounds = array<i64: 1>, scalar_prefetch = 0 : i64, scratch_operands = 0 : i64, tpu.core_type = #tpu.core_type<tc>, window_params = [{transform_indices = @transform_0, window_bounds = array<i64: 8, 896>}, {pipeline_mode = #tpu.pipeline_mode<synchronous>, transform_indices = @transform_1, window_bounds = array<i64: 896, 512>}, {pipeline_mode = #tpu.pipeline_mode<synchronous>, transform_indices = @transform_2, window_bounds = array<i64: 1, 512>}, {pipeline_mode = #tpu.pipeline_mode<synchronous>, transform_indices = @transform_3, window_bounds = array<i64: 512, 256>}, {pipeline_mode = #tpu.pipeline_mode<synchronous>, transform_indices = @transform_4, window_bounds = array<i64: 1, 256>}, {pipeline_mode = #tpu.pipeline_mode<synchronous>, transform_indices = @transform_5, window_bounds = array<i64: 256, 128>}, {pipeline_mode = #tpu.pipeline_mode<synchronous>, transform_indices = @transform_6, window_bounds = array<i64: 1, 128>}, {pipeline_mode = #tpu.pipeline_mode<synchronous>, transform_indices = @transform_7, window_bounds = array<i64: 128, 64>}, {pipeline_mode = #tpu.pipeline_mode<synchronous>, transform_indices = @transform_8, window_bounds = array<i64: 1, 64>}, {pipeline_mode = #tpu.pipeline_mode<synchronous>, transform_indices = @transform_9, window_bounds = array<i64: 64, 32>}, {pipeline_mode = #tpu.pipeline_mode<synchronous>, transform_indices = @transform_10, window_bounds = array<i64: 1, 32>}, {pipeline_mode = #tpu.pipeline_mode<synchronous>, transform_indices = @transform_11, window_bounds = array<i64: 32, 1>}, {pipeline_mode = #tpu.pipeline_mode<synchronous>, transform_indices = @transform_12, window_bounds = array<i64: 1, 1>}, {transform_indices = @transform_13, window_bounds = array<i64: 8, 1>}]} {
    %c0 = arith.constant 0 : index
    %c0_0 = arith.constant 0 : index
    %0 = vector.load %arg1[%c0, %c0_0] : memref<8x896xbf16, #tpu.memory_space<vmem>>, vector<8x896xbf16>
    %c0_1 = arith.constant 0 : index
    %c0_2 = arith.constant 0 : index
    %1 = vector.load %arg2[%c0_1, %c0_2] : memref<896x512xbf16, #tpu.memory_space<vmem>>, vector<896x512xbf16>
    %cst = arith.constant dense<0.000000e+00> : vector<8x512xf32>
    %2 = tpu.matmul %0, %1, %cst {dimension_numbers = #tpu.dot_dimension_numbers<[1], [0], [0], [1], [0, 0, 1, 1], [], []>} : vector<8x896xbf16>, vector<896x512xbf16>, vector<8x512xf32> -> vector<8x512xf32>
    %c0_3 = arith.constant 0 : index
    %c0_4 = arith.constant 0 : index
    %3 = vector.load %arg3[%c0_3, %c0_4] : memref<1x512xf32, #tpu.memory_space<vmem>>, vector<1x512xf32>
    %4 = vector.broadcast %3 : vector<1x512xf32> to vector<8x512xf32>
    %5 = arith.addf %2, %4 : vector<8x512xf32>
    %cst_5 = arith.constant 5.000000e-01 : f32
    %6 = vector.broadcast %cst_5 : f32 to vector<8x512xf32>
    %7 = arith.mulf %6, %5 : vector<8x512xf32>
    %cst_6 = arith.constant 0.707106769 : f32
    %8 = vector.broadcast %cst_6 : f32 to vector<8x512xf32>
    %9 = arith.mulf %5, %8 : vector<8x512xf32>
    %10 = math.erf %9 : vector<8x512xf32>
    %cst_7 = arith.constant 1.000000e+00 : f32
    %11 = vector.broadcast %cst_7 : f32 to vector<8x512xf32>
    %12 = arith.addf %11, %10 : vector<8x512xf32>
    %13 = arith.mulf %7, %12 : vector<8x512xf32>
    %14 = arith.truncf %13 : vector<8x512xf32> to vector<8x512xbf16>
    %c0_8 = arith.constant 0 : index
    %c0_9 = arith.constant 0 : index
    %15 = vector.load %arg4[%c0_8, %c0_9] : memref<512x256xbf16, #tpu.memory_space<vmem>>, vector<512x256xbf16>
    %cst_10 = arith.constant dense<0.000000e+00> : vector<8x256xf32>
    %16 = tpu.matmul %14, %15, %cst_10 {dimension_numbers = #tpu.dot_dimension_numbers<[1], [0], [0], [1], [0, 0, 1, 1], [], []>} : vector<8x512xbf16>, vector<512x256xbf16>, vector<8x256xf32> -> vector<8x256xf32>
    %c0_11 = arith.constant 0 : index
    %c0_12 = arith.constant 0 : index
    %17 = vector.load %arg5[%c0_11, %c0_12] : memref<1x256xf32, #tpu.memory_space<vmem>>, vector<1x256xf32>
    %18 = vector.broadcast %17 : vector<1x256xf32> to vector<8x256xf32>
    %19 = arith.addf %16, %18 : vector<8x256xf32>
    %cst_13 = arith.constant 5.000000e-01 : f32
    %20 = vector.broadcast %cst_13 : f32 to vector<8x256xf32>
    %21 = arith.mulf %20, %19 : vector<8x256xf32>
    %cst_14 = arith.constant 0.707106769 : f32
    %22 = vector.broadcast %cst_14 : f32 to vector<8x256xf32>
    %23 = arith.mulf %19, %22 : vector<8x256xf32>
    %24 = math.erf %23 : vector<8x256xf32>
    %cst_15 = arith.constant 1.000000e+00 : f32
    %25 = vector.broadcast %cst_15 : f32 to vector<8x256xf32>
    %26 = arith.addf %25, %24 : vector<8x256xf32>
    %27 = arith.mulf %21, %26 : vector<8x256xf32>
    %28 = arith.truncf %27 : vector<8x256xf32> to vector<8x256xbf16>
    %c0_16 = arith.constant 0 : index
    %c0_17 = arith.constant 0 : index
    %29 = vector.load %arg6[%c0_16, %c0_17] : memref<256x128xbf16, #tpu.memory_space<vmem>>, vector<256x128xbf16>
    %cst_18 = arith.constant dense<0.000000e+00> : vector<8x128xf32>
    %30 = tpu.matmul %28, %29, %cst_18 {dimension_numbers = #tpu.dot_dimension_numbers<[1], [0], [0], [1], [0, 0, 1, 1], [], []>} : vector<8x256xbf16>, vector<256x128xbf16>, vector<8x128xf32> -> vector<8x128xf32>
    %c0_19 = arith.constant 0 : index
    %c0_20 = arith.constant 0 : index
    %31 = vector.load %arg7[%c0_19, %c0_20] : memref<1x128xf32, #tpu.memory_space<vmem>>, vector<1x128xf32>
    %32 = vector.broadcast %31 : vector<1x128xf32> to vector<8x128xf32>
    %33 = arith.addf %30, %32 : vector<8x128xf32>
    %cst_21 = arith.constant 5.000000e-01 : f32
    %34 = vector.broadcast %cst_21 : f32 to vector<8x128xf32>
    %35 = arith.mulf %34, %33 : vector<8x128xf32>
    %cst_22 = arith.constant 0.707106769 : f32
    %36 = vector.broadcast %cst_22 : f32 to vector<8x128xf32>
    %37 = arith.mulf %33, %36 : vector<8x128xf32>
    %38 = math.erf %37 : vector<8x128xf32>
    %cst_23 = arith.constant 1.000000e+00 : f32
    %39 = vector.broadcast %cst_23 : f32 to vector<8x128xf32>
    %40 = arith.addf %39, %38 : vector<8x128xf32>
    %41 = arith.mulf %35, %40 : vector<8x128xf32>
    %42 = arith.truncf %41 : vector<8x128xf32> to vector<8x128xbf16>
    %c0_24 = arith.constant 0 : index
    %c0_25 = arith.constant 0 : index
    %43 = vector.load %arg8[%c0_24, %c0_25] : memref<128x64xbf16, #tpu.memory_space<vmem>>, vector<128x64xbf16>
    %cst_26 = arith.constant dense<0.000000e+00> : vector<8x64xf32>
    %44 = tpu.matmul %42, %43, %cst_26 {dimension_numbers = #tpu.dot_dimension_numbers<[1], [0], [0], [1], [0, 0, 1, 1], [], []>} : vector<8x128xbf16>, vector<128x64xbf16>, vector<8x64xf32> -> vector<8x64xf32>
    %c0_27 = arith.constant 0 : index
    %c0_28 = arith.constant 0 : index
    %45 = vector.load %arg9[%c0_27, %c0_28] : memref<1x64xf32, #tpu.memory_space<vmem>>, vector<1x64xf32>
    %46 = vector.broadcast %45 : vector<1x64xf32> to vector<8x64xf32>
    %47 = arith.addf %44, %46 : vector<8x64xf32>
    %cst_29 = arith.constant 5.000000e-01 : f32
    %48 = vector.broadcast %cst_29 : f32 to vector<8x64xf32>
    %49 = arith.mulf %48, %47 : vector<8x64xf32>
    %cst_30 = arith.constant 0.707106769 : f32
    %50 = vector.broadcast %cst_30 : f32 to vector<8x64xf32>
    %51 = arith.mulf %47, %50 : vector<8x64xf32>
    %52 = math.erf %51 : vector<8x64xf32>
    %cst_31 = arith.constant 1.000000e+00 : f32
    %53 = vector.broadcast %cst_31 : f32 to vector<8x64xf32>
    %54 = arith.addf %53, %52 : vector<8x64xf32>
    %55 = arith.mulf %49, %54 : vector<8x64xf32>
    %56 = arith.truncf %55 : vector<8x64xf32> to vector<8x64xbf16>
    %c0_32 = arith.constant 0 : index
    %c0_33 = arith.constant 0 : index
    %57 = vector.load %arg10[%c0_32, %c0_33] : memref<64x32xbf16, #tpu.memory_space<vmem>>, vector<64x32xbf16>
    %cst_34 = arith.constant dense<0.000000e+00> : vector<8x32xf32>
    %58 = tpu.matmul %56, %57, %cst_34 {dimension_numbers = #tpu.dot_dimension_numbers<[1], [0], [0], [1], [0, 0, 1, 1], [], []>} : vector<8x64xbf16>, vector<64x32xbf16>, vector<8x32xf32> -> vector<8x32xf32>
    %c0_35 = arith.constant 0 : index
    %c0_36 = arith.constant 0 : index
    %59 = vector.load %arg11[%c0_35, %c0_36] : memref<1x32xf32, #tpu.memory_space<vmem>>, vector<1x32xf32>
    %60 = vector.broadcast %59 : vector<1x32xf32> to vector<8x32xf32>
    %61 = arith.addf %58, %60 : vector<8x32xf32>
    %cst_37 = arith.constant 5.000000e-01 : f32
    %62 = vector.broadcast %cst_37 : f32 to vector<8x32xf32>
    %63 = arith.mulf %62, %61 : vector<8x32xf32>
    %cst_38 = arith.constant 0.707106769 : f32
    %64 = vector.broadcast %cst_38 : f32 to vector<8x32xf32>
    %65 = arith.mulf %61, %64 : vector<8x32xf32>
    %66 = math.erf %65 : vector<8x32xf32>
    %cst_39 = arith.constant 1.000000e+00 : f32
    %67 = vector.broadcast %cst_39 : f32 to vector<8x32xf32>
    %68 = arith.addf %67, %66 : vector<8x32xf32>
    %69 = arith.mulf %63, %68 : vector<8x32xf32>
    %70 = arith.truncf %69 : vector<8x32xf32> to vector<8x32xbf16>
    %c0_40 = arith.constant 0 : index
    %c0_41 = arith.constant 0 : index
    %71 = vector.load %arg12[%c0_40, %c0_41] : memref<32x1xbf16, #tpu.memory_space<vmem>>, vector<32x1xbf16>
    %cst_42 = arith.constant dense<0.000000e+00> : vector<8x1xf32>
    %72 = tpu.matmul %70, %71, %cst_42 {dimension_numbers = #tpu.dot_dimension_numbers<[1], [0], [0], [1], [0, 0, 1, 1], [], []>} : vector<8x32xbf16>, vector<32x1xbf16>, vector<8x1xf32> -> vector<8x1xf32>
    %c0_43 = arith.constant 0 : index
    %c0_44 = arith.constant 0 : index
    %73 = vector.load %arg13[%c0_43, %c0_44] : memref<1x1xf32, #tpu.memory_space<vmem>>, vector<1x1xf32>
    %74 = vector.broadcast %73 : vector<1x1xf32> to vector<8x1xf32>
    %75 = arith.addf %72, %74 : vector<8x1xf32>
    %76 = arith.negf %75 : vector<8x1xf32>
    %77 = math.exp %76 : vector<8x1xf32>
    %cst_45 = arith.constant 1.000000e+00 : f32
    %78 = vector.broadcast %cst_45 : f32 to vector<8x1xf32>
    %79 = arith.addf %78, %77 : vector<8x1xf32>
    %80 = arith.divf %78, %79 : vector<8x1xf32>
    %c0_46 = arith.constant 0 : index
    %c0_47 = arith.constant 0 : index
    %81 = vector.load %arg14[%c0_46, %c0_47] : memref<8x1xf32, #tpu.memory_space<vmem>>, vector<8x1xf32>
    tpu.vector_store %arg14[%c0_46, %c0_47], %80 {strides = array<i32>} : memref<8x1xf32, #tpu.memory_space<vmem>>, vector<8x1xf32>,
    return
  }
  func.func @transform_0(%arg0: i32) -> (i32, i32) {
    %c0_i32 = arith.constant 0 : i32
    %c0_i32_0 = arith.constant 0 : i32
    return %arg0, %c0_i32 : i32, i32
  }
  func.func @transform_1(%arg0: i32) -> (i32, i32) {
    %c0_i32 = arith.constant 0 : i32
    %c0_i32_0 = arith.constant 0 : i32
    %c0_i32_1 = arith.constant 0 : i32
    return %c0_i32, %c0_i32_0 : i32, i32
  }
  func.func @transform_2(%arg0: i32) -> (i32, i32) {
    %c0_i32 = arith.constant 0 : i32
    %c0_i32_0 = arith.constant 0 : i32
    %c0_i32_1 = arith.constant 0 : i32
    return %c0_i32, %c0_i32_0 : i32, i32
  }
  func.func @transform_3(%arg0: i32) -> (i32, i32) {
    %c0_i32 = arith.constant 0 : i32
    %c0_i32_0 = arith.constant 0 : i32
    %c0_i32_1 = arith.constant 0 : i32
    return %c0_i32, %c0_i32_0 : i32, i32
  }
  func.func @transform_4(%arg0: i32) -> (i32, i32) {
    %c0_i32 = arith.constant 0 : i32
    %c0_i32_0 = arith.constant 0 : i32
    %c0_i32_1 = arith.constant 0 : i32
    return %c0_i32, %c0_i32_0 : i32, i32
  }
  func.func @transform_5(%arg0: i32) -> (i32, i32) {
    %c0_i32 = arith.constant 0 : i32
    %c0_i32_0 = arith.constant 0 : i32
    %c0_i32_1 = arith.constant 0 : i32
    return %c0_i32, %c0_i32_0 : i32, i32
  }
  func.func @transform_6(%arg0: i32) -> (i32, i32) {
    %c0_i32 = arith.constant 0 : i32
    %c0_i32_0 = arith.constant 0 : i32
    %c0_i32_1 = arith.constant 0 : i32
    return %c0_i32, %c0_i32_0 : i32, i32
  }
  func.func @transform_7(%arg0: i32) -> (i32, i32) {
    %c0_i32 = arith.constant 0 : i32
    %c0_i32_0 = arith.constant 0 : i32
    %c0_i32_1 = arith.constant 0 : i32
    return %c0_i32, %c0_i32_0 : i32, i32
  }
  func.func @transform_8(%arg0: i32) -> (i32, i32) {
    %c0_i32 = arith.constant 0 : i32
    %c0_i32_0 = arith.constant 0 : i32
    %c0_i32_1 = arith.constant 0 : i32
    return %c0_i32, %c0_i32_0 : i32, i32
  }
  func.func @transform_9(%arg0: i32) -> (i32, i32) {
    %c0_i32 = arith.constant 0 : i32
    %c0_i32_0 = arith.constant 0 : i32
    %c0_i32_1 = arith.constant 0 : i32
    return %c0_i32, %c0_i32_0 : i32, i32
  }
  func.func @transform_10(%arg0: i32) -> (i32, i32) {
    %c0_i32 = arith.constant 0 : i32
    %c0_i32_0 = arith.constant 0 : i32
    %c0_i32_1 = arith.constant 0 : i32
    return %c0_i32, %c0_i32_0 : i32, i32
  }
  func.func @transform_11(%arg0: i32) -> (i32, i32) {
    %c0_i32 = arith.constant 0 : i32
    %c0_i32_0 = arith.constant 0 : i32
    %c0_i32_1 = arith.constant 0 : i32
    return %c0_i32, %c0_i32_0 : i32, i32
  }
  func.func @transform_12(%arg0: i32) -> (i32, i32) {
    %c0_i32 = arith.constant 0 : i32
    %c0_i32_0 = arith.constant 0 : i32
    %c0_i32_1 = arith.constant 0 : i32
    return %c0_i32, %c0_i32_0 : i32, i32
  }
  func.func @transform_13(%arg0: i32) -> (i32, i32) {
    %c0_i32 = arith.constant 0 : i32
    %c0_i32_0 = arith.constant 0 : i32
    return %arg0, %c0_i32 : i32, i32
  }
}

</mosaic_0001>

<bundles_post_ra>
// kernel: tpu_custom_call.1
= control target key start
LH: loop header
LB: loop body
LE: loop exit
PB: predicated region body
PF: predicated region fallthrough
CT: control target
= control target key end

     0   :  { %s4156_s0 = inlined_call_operand.hbm [shape: bf16[8,896], index: 0, kind: input, shape index: {}]   ;;  %s4157_s1 = inlined_call_operand.hbm [shape: bf16[896,512], index: 1, kind: input, shape index: {}]   ;;  %s4158_s2 = inlined_call_operand.hbm [shape: f32[1,512], index: 2, kind: input, shape index: {}]   ;;  %s4159_s3 = inlined_call_operand.hbm [shape: bf16[512,256], index: 3, kind: input, shape index: {}]   ;;  %s4160_s4 = inlined_call_operand.hbm [shape: f32[1,256], index: 4, kind: input, shape index: {}]   ;;  %s4161_s5 = inlined_call_operand.vmem [shape: bf16[256,128], index: 5, kind: input, shape index: {}]   ;;  %s4162_s6 = inlined_call_operand.vmem [shape: f32[1,128], index: 6, kind: input, shape index: {}]   ;;  %s4163_s7 = inlined_call_operand.vmem [shape: bf16[128,64], index: 7, kind: input, shape index: {}]   ;;  %s4164_s8 = inlined_call_operand.hbm [shape: f32[1,64], index: 8, kind: input, shape index: {}]   ;;  %s4165_s9 = inlined_call_operand.vmem [shape: bf16[64,32], index: 9, kind: input, shape index: {}]   ;;  %s4166_s10 = inlined_call_operand.vmem [shape: f32[1,32], index: 10, kind: input, shape index: {}]   ;;  %s4167_s11 = inlined_call_operand.vmem [shape: bf16[32,1], index: 11, kind: input, shape index: {}]   ;;  %s4168_s12 = inlined_call_operand.<no memory space> [shape: f32[1,1], index: 12, kind: input, shape index: {}]   ;;  %s4169_s13 = inlined_call_operand.vmem [shape: f32[8,1], index: 13, kind: output, shape index: {}]  }
   0x1   :  { %v18_v0 = vstv %s4168_s12 }
   0x2   :  { %19 = vst [vmem:[#allocation2] sm:$0x1] %v18_v0 }
   0x3   :  { %20 = vsyncpa [#allocation4], 0 }
   0x4   :  { %21 = vsyncpa [#allocation6], 0 }
   0x5   :  { %22 = vsyncpa [#allocation9], 0 }
   0x6   :  { %23 = vsyncpa [#allocation12], 0  ;;  %s3871_s27 = smov [#allocation5]  }
   0x7   :  { %s39_s28 = sshll.u32 %s3871_s27, 4  ;;  %s40_s28 = int_to_ptr.vmem [resolvable:$true] %s39_s28 }
   0x8   :  { %s3751_s29 = scalar_lea.vmem %s40_s28, 28672  ;;  %p3756_p1 = scmp.lt.s32.totalorder %s40_s28, %s40_s28 }
   0x9   :  { %p3752_p0 = scmp.ne.s32.totalorder %s40_s28, %s3751_s29  ;;  %p3757_p2 = scmp.lt.s32.totalorder %s3751_s29, %s3751_s29 }
   0xb   :  { %p3758_p3 = por %p3757_p2, %p3756_p1 }
   0xd   :  { %p3759_p4 = pnand %p3758_p3, %p3752_p0 }
   0xf   :  { %3762 = shalt.err (!%p3759_p4)
}
  0x10   :  { %s3872_s30 = smov 256   ;;  %s3873_s14 = smov 16  }
  0x11   :  { %45 = dma.hbm_to_vmem [thread:$0]  %s4157_s1, 28672, %s40_s28, [#allocation6], %s3872_s30, %s3872_s30, %s3873_s14  }
  0x12   :  { %s3874_s12 = smov [#allocation8]  }
  0x13   :  { %s61_s17 = sshll.u32 %s3874_s12, 4  ;;  %s62_s17 = int_to_ptr.vmem [resolvable:$true] %s61_s17 }
  0x14   :  { %s3771_s18 = scalar_lea.vmem %s62_s17, 8192  ;;  %p3776_p6 = scmp.lt.s32.totalorder %s62_s17, %s62_s17 }
  0x15   :  { %p3772_p5 = scmp.ne.s32.totalorder %s62_s17, %s3771_s18  ;;  %p3777_p7 = scmp.lt.s32.totalorder %s3771_s18, %s3771_s18 }
  0x17   :  { %p3778_p8 = por %p3777_p7, %p3776_p6 }
  0x19   :  { %p3779_p9 = pnand %p3778_p8, %p3772_p5 }
  0x1b   :  { %3782 = shalt.err (!%p3779_p9)
}
  0x1c   :  { %s3875_s19 = smov 128   ;;  %s3876_s20 = smov 8  }
  0x1d   :  { %67 = dma.hbm_to_vmem [thread:$0]  %s4159_s3, 8192, %s62_s17, [#allocation9], %s3875_s19, %s3875_s19, %s3876_s20  }
  0x1e   :  { %s3877_s23 = smov [#allocation3]   ;;  %s3878_s25 = smov [#allocation7]  }
  0x1f   :  { %s30_s24 = sshll.u32 %s3877_s23, 4  ;;  %s52_s1 = sshll.u32 %s3878_s25, 4  ;;  %s31_s24 = int_to_ptr.vmem [resolvable:$true] %s30_s24  ;;  %s53_s1 = int_to_ptr.vmem [resolvable:$true] %s52_s1 }
  0x20   :  { %s3791_s26 = scalar_lea.vmem %s31_s24, 448  ;;  %p3796_p11 = scmp.lt.s32.totalorder %s31_s24, %s31_s24 }
  0x21   :  { %p3792_p10 = scmp.ne.s32.totalorder %s31_s24, %s3791_s26  ;;  %p3797_p12 = scmp.lt.s32.totalorder %s3791_s26, %s3791_s26 }
  0x23   :  { %p3798_p13 = por %p3797_p12, %p3796_p11 }
  0x25   :  { %p3799_p0 = pnand %p3798_p13, %p3792_p10 }
  0x27   :  { %3802 = shalt.err (!%p3799_p0)
}
  0x28   :  { %33 = dma.hbm_to_vmem [thread:$0]  %s4156_s0, 448, %s31_s24, [#allocation4]  }
  0x29   :  { %s3811_s29 = scalar_lea.vmem %s53_s1, 64  ;;  %p3816_p2 = scmp.lt.s32.totalorder %s53_s1, %s53_s1 }
  0x2a   :  { %p3812_p1 = scmp.ne.s32.totalorder %s53_s1, %s3811_s29  ;;  %p3817_p3 = scmp.lt.s32.totalorder %s3811_s29, %s3811_s29 }
  0x2c   :  { %p3818_p4 = por %p3817_p3, %p3816_p2 }
  0x2e   :  { %p3819_p5 = pnand %p3818_p4, %p3812_p1 }
  0x30   :  { %3822 = shalt.err (!%p3819_p5)
}
  0x31   :  { %55 = dma.hbm_to_vmem [thread:$0]  %s4158_s2, 64, %s53_s1, [#allocation6]  }
  0x32   :  { %s3879_s14 = smov [#allocation10]   ;;  %s3880_s16 = smov [#allocation11]  }
  0x33   :  { %s74_s15 = sshll.u32 %s3879_s14, 4  ;;  %s90_s12 = sshll.u32 %s3880_s16, 4  ;;  %s75_s15 = int_to_ptr.vmem [resolvable:$true] %s74_s15  ;;  %s91_s12 = int_to_ptr.vmem [resolvable:$true] %s90_s12 }
  0x34   :  { %s3831_s17 = scalar_lea.vmem %s75_s15, 32  ;;  %p3836_p7 = scmp.lt.s32.totalorder %s75_s15, %s75_s15 }
  0x35   :  { %p3832_p6 = scmp.ne.s32.totalorder %s75_s15, %s3831_s17  ;;  %p3837_p8 = scmp.lt.s32.totalorder %s3831_s17, %s3831_s17 }
  0x37   :  { %p3838_p9 = por %p3837_p8, %p3836_p7 }
  0x39   :  { %p3839_p10 = pnand %p3838_p9, %p3832_p6 }
  0x3b   :  { %3842 = shalt.err (!%p3839_p10)
}
  0x3c   :  { %77 = dma.hbm_to_vmem [thread:$0]  %s4160_s4, 32, %s75_s15, [#allocation9]  }
  0x3d   :  { %s3851_s19 = scalar_lea.vmem %s91_s12, 16  ;;  %s3855_s2 = scalar_lea.vmem %s91_s12, 32 }
  0x3e   :  { %p3852_p11 = scmp.ne.s32.totalorder %s91_s12, %s3851_s19  ;;  %p3856_p12 = scmp.lt.s32.totalorder %s91_s12, %s91_s12 }
  0x3f   :  { %p3857_p13 = scmp.lt.s32.totalorder %s3855_s2, %s3851_s19 }
  0x41   :  { %p3858_p0 = por %p3857_p13, %p3856_p12 }
  0x43   :  { %p3859_p1 = pnand %p3858_p0, %p3852_p11 }
  0x45   :  { %3862 = shalt.err (!%p3859_p1)
}
  0x46   :  { %93 = dma.hbm_to_vmem [thread:$0]  %s4164_s8, 16, %s91_s12, [#allocation12]  }
  0x47   :  { %3863 = dma.done.wait [#allocation4], 448  }
  0x48   :  { %3864 = vsyncadd [#allocation4], 4294966848 }
  0x49   :  { %3865 = dma.done.wait [#allocation6], 28736  }
  0x4a   :  { %3866 = vsyncadd [#allocation6], 4294938560 }
  0x4b   :  { %3867 = dma.done.wait [#allocation9], 8224  }
  0x4c   :  { %3868 = vsyncadd [#allocation9], 4294959072 }
  0x4d   :  { %3869 = dma.done.wait [#allocation12], 16  }
  0x4e   :  { %3870 = vsyncadd [#allocation12], 4294967280  ;;  %v3252_v1 = vld [vmem:[#allocation5 + $0xe4] ss:$16 sps:$4 sm:$0xff]   ;;  %v3256_v3 = vld [vmem:[#allocation5 + $0xe0] ss:$16 sps:$4 sm:$0xff]  }
  0x4f   :  { %v3254_v2 = vld [vmem:[#allocation5 + $0x2e4] ss:$16 sps:$4 sm:$0xff]   ;;  %1516 = vmatprep.subr.bf16.mxu0 %v3252_v1  ;;  %v3257_v4 = vld [vmem:[#allocation5 + $0x2e0] ss:$16 sps:$4 sm:$0xff]   ;;  %vm3883_vm0 = vmmov 0   ;;  %vm2695_vm1 = vcmask 523264  }
  0x50   :  { %1557 = vmatprep.subr.bf16.mxu1 %v3254_v2  ;;  %v3258_v5 = vld [vmem:[#allocation5 + $0xc4] ss:$16 sps:$4 sm:$0xff]   ;;  %1517 = vmatpush1.bf16.msra.mxu0 %v3256_v3  ;;  %v3262_v7 = vld [vmem:[#allocation5 + $0xc0] ss:$16 sps:$4 sm:$0xff]   ;;  %vm2768_vm2 = vcmask 261120   ;;  %vm2818_vm3 = vcmask 7168  }
  0x51   :  { %1558 = vmatpush1.bf16.msra.mxu1 %v3257_v4  ;;  %v3260_v6 = vld [vmem:[#allocation5 + $0x2c4] ss:$16 sps:$4 sm:$0xff]   ;;  %1518 = vmatprep.subr.bf16.mxu0 %v3258_v5  ;;  %v3263_v8 = vld [vmem:[#allocation5 + $0x2c0] ss:$16 sps:$4 sm:$0xff]  }
  0x52   :  { %1559 = vmatprep.subr.bf16.mxu1 %v3260_v6  ;;  %v3264_v9 = vld [vmem:[#allocation5 + $0xa4] ss:$16 sps:$4 sm:$0xff]   ;;  %v3268_v11 = vld [vmem:[#allocation5 + $0xa0] ss:$16 sps:$4 sm:$0xff]  }
  0x53   :  { %v3266_v10 = vld [vmem:[#allocation5 + $0x2a4] ss:$16 sps:$4 sm:$0xff]   ;;  %v3269_v12 = vld [vmem:[#allocation5 + $0x2a0] ss:$16 sps:$4 sm:$0xff]  }
  0x54   :  { %1519 = vmatpush1.bf16.msra.mxu0 %v3262_v7  ;;  %v3270_v13 = vld [vmem:[#allocation5 + $0x84] ss:$16 sps:$4 sm:$0xff]   ;;  %v3274_v15 = vld [vmem:[#allocation5 + $0x80] ss:$16 sps:$4 sm:$0xff]  }
  0x55   :  { %1560 = vmatpush1.bf16.msra.mxu1 %v3263_v8  ;;  %1520 = vmatprep.subr.bf16.mxu0 %v3264_v9  ;;  %v3272_v14 = vld [vmem:[#allocation5 + $0x284] ss:$16 sps:$4 sm:$0xff]   ;;  %v3275_v16 = vld [vmem:[#allocation5 + $0x280] ss:$16 sps:$4 sm:$0xff]  }
  0x56   :  { %1561 = vmatprep.subr.bf16.mxu1 %v3266_v10  ;;  %v3276_v17 = vld [vmem:[#allocation5 + $0x64] ss:$16 sps:$4 sm:$0xff]   ;;  %v3280_v19 = vld [vmem:[#allocation5 + $0x60] ss:$16 sps:$4 sm:$0xff]  }
  0x57   :  { %v3278_v18 = vld [vmem:[#allocation5 + $0x264] ss:$16 sps:$4 sm:$0xff]   ;;  %v3281_v20 = vld [vmem:[#allocation5 + $0x260] ss:$16 sps:$4 sm:$0xff]  }
  0x58   :  { %1521 = vmatpush1.bf16.msra.mxu0 %v3268_v11  ;;  %v3282_v21 = vld [vmem:[#allocation5 + $0x44] ss:$16 sps:$4 sm:$0xff]   ;;  %v3286_v23 = vld [vmem:[#allocation5 + $0x40] ss:$16 sps:$4 sm:$0xff]  }
  0x59   :  { %1562 = vmatpush1.bf16.msra.mxu1 %v3269_v12  ;;  %1522 = vmatprep.subr.bf16.mxu0 %v3270_v13  ;;  %v3284_v22 = vld [vmem:[#allocation5 + $0x244] ss:$16 sps:$4 sm:$0xff]   ;;  %v3287_v24 = vld [vmem:[#allocation5 + $0x240] ss:$16 sps:$4 sm:$0xff]  }
  0x5a   :  { %1563 = vmatprep.subr.bf16.mxu1 %v3272_v14  ;;  %v3288_v25 = vld [vmem:[#allocation5 + $0x24] ss:$16 sps:$4 sm:$0xff]   ;;  %v3292_v27 = vld [vmem:[#allocation5 + $0x20] ss:$16 sps:$4 sm:$0xff]  }
  0x5b   :  { %v3290_v26 = vld [vmem:[#allocation5 + $0x224] ss:$16 sps:$4 sm:$0xff]   ;;  %v3293_v28 = vld [vmem:[#allocation5 + $0x220] ss:$16 sps:$4 sm:$0xff]  }
  0x5c   :  { %1523 = vmatpush1.bf16.msra.mxu0 %v3274_v15  ;;  %v3294_v29 = vld [vmem:[#allocation5 + $0x4] ss:$16 sps:$4 sm:$0xff]   ;;  %v3298_v31 = vld [vmem:[#allocation5] ss:$16 sps:$4 sm:$0xff]  }
  0x5d   :  { %1564 = vmatpush1.bf16.msra.mxu1 %v3275_v16  ;;  %1524 = vmatprep.subr.bf16.mxu0 %v3276_v17  ;;  %v3296_v30 = vld [vmem:[#allocation5 + $0x204] ss:$16 sps:$4 sm:$0xff]   ;;  %v3299_v32 = vld [vmem:[#allocation5 + $0x200] ss:$16 sps:$4 sm:$0xff]   ;;  %v3881_v17 = vmov 0  }
  0x5e   :  { %1565 = vmatprep.subr.bf16.mxu1 %v3278_v18  ;;  %v3300_v33 = vld [vmem:[#allocation5 + $0x1e4] ss:$16 sps:$4 sm:$0xff]   ;;  %v3304_v35 = vld [vmem:[#allocation5 + $0x1e0] ss:$16 sps:$4 sm:$0xff]  }
  0x5f   :  { %v3302_v34 = vld [vmem:[#allocation5 + $0x3e4] ss:$16 sps:$4 sm:$0xff]   ;;  %v3305_v36 = vld [vmem:[#allocation5 + $0x3e0] ss:$16 sps:$4 sm:$0xff]  }
  0x60   :  { %1525 = vmatpush1.bf16.msra.mxu0 %v3280_v19  ;;  %v3306_v37 = vld [vmem:[#allocation5 + $0x1c4] ss:$16 sps:$4 sm:$0xff]   ;;  %v3310_v39 = vld [vmem:[#allocation5 + $0x1c0] ss:$16 sps:$4 sm:$0xff]  }
  0x61   :  { %1566 = vmatpush1.bf16.msra.mxu1 %v3281_v20  ;;  %1526 = vmatprep.subr.bf16.mxu0 %v3282_v21  ;;  %v3308_v38 = vld [vmem:[#allocation5 + $0x3c4] ss:$16 sps:$4 sm:$0xff]   ;;  %v3311_v40 = vld [vmem:[#allocation5 + $0x3c0] ss:$16 sps:$4 sm:$0xff]  }
  0x62   :  { %1567 = vmatprep.subr.bf16.mxu1 %v3284_v22  ;;  %v3312_v41 = vld [vmem:[#allocation5 + $0x1a4] ss:$16 sps:$4 sm:$0xff]   ;;  %v3316_v43 = vld [vmem:[#allocation5 + $0x1a0] ss:$16 sps:$4 sm:$0xff]  }
  0x63   :  { %v3314_v42 = vld [vmem:[#allocation5 + $0x3a4] ss:$16 sps:$4 sm:$0xff]   ;;  %v3317_v44 = vld [vmem:[#allocation5 + $0x3a0] ss:$16 sps:$4 sm:$0xff]  }
  0x64   :  { %1527 = vmatpush1.bf16.msra.mxu0 %v3286_v23  ;;  %v3318_v45 = vld [vmem:[#allocation5 + $0x184] ss:$16 sps:$4 sm:$0xff]   ;;  %v122_v49 = vld [vmem:[#allocation3 + $0x8] sm:$0xff] }
  0x65   :  { %1568 = vmatpush1.bf16.msra.mxu1 %v3287_v24  ;;  %1528 = vmatprep.subr.bf16.mxu0 %v3288_v25  ;;  %v3320_v46 = vld [vmem:[#allocation5 + $0x384] ss:$16 sps:$4 sm:$0xff]   ;;  %v3322_v50 = vld [vmem:[#allocation5 + $0x180] ss:$16 sps:$4 sm:$0xff]   ;;  %v3977_v52 = vcombine.high %v122_v49, %v122_v49  ;;  %v3983_v8 = vcombine.low %v122_v49, %v122_v49  ;;  %v3412_v49 = vld [vmem:[#allocation5 + $0xcc] ss:$16 sps:$4 sm:$0xff]  }
  0x66   :  { %1569 = vmatprep.subr.bf16.mxu1 %v3290_v26  ;;  %v121_v47 = vld [vmem:[#allocation3] sm:$0xff]  ;;  %v3323_v51 = vld [vmem:[#allocation5 + $0x380] ss:$16 sps:$4 sm:$0xff]  }
  0x67   :  { %v3975_v48 = vcombine.high %v121_v47, %v121_v47  ;;  %v3324_v53 = vld [vmem:[#allocation5 + $0x164] ss:$16 sps:$4 sm:$0xff]   ;;  %1589 = vmatprep.mubr.bf16.mxu1 %v3977_v52  ;;  %v3328_v55 = vld [vmem:[#allocation5 + $0x160] ss:$16 sps:$4 sm:$0xff]   ;;  %v3981_v7 = vcombine.low %v121_v47, %v121_v47 }
  0x68   :  { %1529 = vmatpush1.bf16.msra.mxu0 %v3292_v27  ;;  %v3326_v54 = vld [vmem:[#allocation5 + $0x364] ss:$16 sps:$4 sm:$0xff]   ;;  %v3329_v56 = vld [vmem:[#allocation5 + $0x360] ss:$16 sps:$4 sm:$0xff]  }
  0x69   :  { %1570 = vmatpush1.bf16.msra.mxu1 %v3293_v28  ;;  %1530 = vmatprep.subr.bf16.mxu0 %v3294_v29  ;;  %v3330_v57 = vld [vmem:[#allocation5 + $0x144] ss:$16 sps:$4 sm:$0xff]   ;;  %v3334_v59 = vld [vmem:[#allocation5 + $0x140] ss:$16 sps:$4 sm:$0xff]  }
  0x6a   :  { %1571 = vmatprep.subr.bf16.mxu1 %v3296_v30  ;;  %1548 = vmatprep.mubr.bf16.mxu0 %v3975_v48  ;;  %v3332_v58 = vld [vmem:[#allocation5 + $0x344] ss:$16 sps:$4 sm:$0xff]   ;;  %v3335_v60 = vld [vmem:[#allocation5 + $0x340] ss:$16 sps:$4 sm:$0xff]  }
  0x6b   :  { %v3336_v61 = vld [vmem:[#allocation5 + $0x124] ss:$16 sps:$4 sm:$0xff]   ;;  %v3340_v63 = vld [vmem:[#allocation5 + $0x120] ss:$16 sps:$4 sm:$0xff]  }
  0x6c   :  { %1531 = vmatpush1.bf16.msra.mxu0 %v3298_v31  ;;  %v3338_v62 = vld [vmem:[#allocation5 + $0x324] ss:$16 sps:$4 sm:$0xff]   ;;  %v3341_v0 = vld [vmem:[#allocation5 + $0x320] ss:$16 sps:$4 sm:$0xff]  }
  0x6d   :  { %1572 = vmatpush1.bf16.msra.mxu1 %v3299_v32  ;;  %1532 = vmatprep.subr.bf16.mxu0 %v3300_v33  ;;  %v3342_v1 = vld [vmem:[#allocation5 + $0x104] ss:$16 sps:$4 sm:$0xff]   ;;  %v3346_v3 = vld [vmem:[#allocation5 + $0x100] ss:$16 sps:$4 sm:$0xff]  }
  0x6e   :  { %1573 = vmatprep.subr.bf16.mxu1 %v3302_v34  ;;  %v3344_v2 = vld [vmem:[#allocation5 + $0x304] ss:$16 sps:$4 sm:$0xff]   ;;  %v3347_v4 = vld [vmem:[#allocation5 + $0x300] ss:$16 sps:$4 sm:$0xff]  }
  0x6f   :  { %v3354_v5 = vld [vmem:[#allocation5 + $0x4e4] ss:$16 sps:$4 sm:$0xff]   ;;  %v3352_v9 = vld [vmem:[#allocation5 + $0x4e0] ss:$16 sps:$4 sm:$0xff]  }
  0x70   :  { %1533 = vmatpush2.bf16.msra.mxu0 %v3304_v35  ;;  %v3357_v6 = vld [vmem:[#allocation5 + $0x6e4] ss:$16 sps:$4 sm:$0xff]   ;;  %v3355_v10 = vld [vmem:[#allocation5 + $0x6e0] ss:$16 sps:$4 sm:$0xff]  }
  0x71   :  { %1574 = vmatpush2.bf16.msra.mxu1 %v3305_v36  ;;  %1534 = vmatprep.subr.bf16.mxu0 %v3306_v37  ;;  %v3360_v11 = vld [vmem:[#allocation5 + $0x4c4] ss:$16 sps:$4 sm:$0xff]   ;;  %v3358_v13 = vld [vmem:[#allocation5 + $0x4c0] ss:$16 sps:$4 sm:$0xff]  }
  0x72   :  { %1575 = vmatprep.subr.bf16.mxu1 %v3308_v38  ;;  %v3363_v12 = vld [vmem:[#allocation5 + $0x6c4] ss:$16 sps:$4 sm:$0xff]   ;;  %v3361_v14 = vld [vmem:[#allocation5 + $0x6c0] ss:$16 sps:$4 sm:$0xff]  }
  0x73   :  { %v3366_v15 = vld [vmem:[#allocation5 + $0x4a4] ss:$16 sps:$4 sm:$0xff]   ;;  %v3364_v18 = vld [vmem:[#allocation5 + $0x4a0] ss:$16 sps:$4 sm:$0xff]  }
  0x74   :  { %1535 = vmatpush2.bf16.msra.mxu0 %v3310_v39  ;;  %v3369_v16 = vld [vmem:[#allocation5 + $0x6a4] ss:$16 sps:$4 sm:$0xff]   ;;  %v3367_v19 = vld [vmem:[#allocation5 + $0x6a0] ss:$16 sps:$4 sm:$0xff]  }
  0x75   :  { %1576 = vmatpush2.bf16.msra.mxu1 %v3311_v40  ;;  %1536 = vmatprep.subr.bf16.mxu0 %v3312_v41  ;;  %v3372_v20 = vld [vmem:[#allocation5 + $0x484] ss:$16 sps:$4 sm:$0xff]   ;;  %v3370_v22 = vld [vmem:[#allocation5 + $0x480] ss:$16 sps:$4 sm:$0xff]  }
  0x76   :  { %1577 = vmatprep.subr.bf16.mxu1 %v3314_v42  ;;  %v3375_v21 = vld [vmem:[#allocation5 + $0x684] ss:$16 sps:$4 sm:$0xff]   ;;  %v3373_v23 = vld [vmem:[#allocation5 + $0x680] ss:$16 sps:$4 sm:$0xff]  }
  0x77   :  { %v3378_v24 = vld [vmem:[#allocation5 + $0x464] ss:$16 sps:$4 sm:$0xff]   ;;  %v3376_v26 = vld [vmem:[#allocation5 + $0x460] ss:$16 sps:$4 sm:$0xff]  }
  0x78   :  { %1537 = vmatpush2.bf16.msra.mxu0 %v3316_v43  ;;  %v3381_v25 = vld [vmem:[#allocation5 + $0x664] ss:$16 sps:$4 sm:$0xff]   ;;  %v3379_v27 = vld [vmem:[#allocation5 + $0x660] ss:$16 sps:$4 sm:$0xff]   ;;  %v3406_v43 = vld [vmem:[#allocation5 + $0xec] ss:$16 sps:$4 sm:$0xff]  }
  0x79   :  { %1578 = vmatpush2.bf16.msra.mxu1 %v3317_v44  ;;  %1538 = vmatprep.subr.bf16.mxu0 %v3318_v45  ;;  %v3384_v28 = vld [vmem:[#allocation5 + $0x444] ss:$16 sps:$4 sm:$0xff]   ;;  %v3382_v30 = vld [vmem:[#allocation5 + $0x440] ss:$16 sps:$4 sm:$0xff]   ;;  %v3995_v45 = vld [vmem:[#allocation3 + $0x18] ss:$0 sps:$4 sm:$0xff]  }
  0x7a   :  { %1579 = vmatprep.subr.bf16.mxu1 %v3320_v46  ;;  %v3387_v29 = vld [vmem:[#allocation5 + $0x644] ss:$16 sps:$4 sm:$0xff]   ;;  %v3385_v31 = vld [vmem:[#allocation5 + $0x640] ss:$16 sps:$4 sm:$0xff]   ;;  %v3404_v46 = vld [vmem:[#allocation5 + $0xe8] ss:$16 sps:$4 sm:$0xff]  }
  0x7b   :  { %v3390_v32 = vld [vmem:[#allocation5 + $0x424] ss:$16 sps:$4 sm:$0xff]   ;;  %v3388_v35 = vld [vmem:[#allocation5 + $0x420] ss:$16 sps:$4 sm:$0xff]  }
  0x7c   :  { %1539 = vmatpush2.bf16.msra.mxu0 %v3322_v50  ;;  %v3393_v33 = vld [vmem:[#allocation5 + $0x624] ss:$16 sps:$4 sm:$0xff]   ;;  %v3391_v37 = vld [vmem:[#allocation5 + $0x620] ss:$16 sps:$4 sm:$0xff]  }
  0x7d   :  { %1580 = vmatpush2.bf16.msra.mxu1 %v3323_v51  ;;  %1540 = vmatprep.subr.bf16.mxu0 %v3324_v53  ;;  %v3988_v34 = vld [vmem:[#allocation3 + $0x10] sm:$0xff]  ;;  %v3394_v40 = vld [vmem:[#allocation5 + $0x400] ss:$16 sps:$4 sm:$0xff]  }
  0x7e   :  { %1581 = vmatprep.subr.bf16.mxu1 %v3326_v54  ;;  %v3992_v36 = vcombine.high %v3988_v34, %v3988_v34  ;;  %v3396_v38 = vld [vmem:[#allocation5 + $0x404] ss:$16 sps:$4 sm:$0xff]   ;;  %v3397_v41 = vld [vmem:[#allocation5 + $0x600] ss:$16 sps:$4 sm:$0xff]   ;;  %v3410_v51 = vld [vmem:[#allocation5 + $0xc8] ss:$16 sps:$4 sm:$0xff]  }
  0x7f   :  { %v3399_v39 = vld [vmem:[#allocation5 + $0x604] ss:$16 sps:$4 sm:$0xff]   ;;  %v3400_v44 = vld [vmem:[#allocation5 + $0x5e0] ss:$16 sps:$4 sm:$0xff]   ;;  %v3418_v54 = vld [vmem:[#allocation5 + $0xac] ss:$16 sps:$4 sm:$0xff]  }
  0x80   :  { %1541 = vmatpush2.bf16.msra.mxu0 %v3328_v55  ;;  %v3402_v42 = vld [vmem:[#allocation5 + $0x5e4] ss:$16 sps:$4 sm:$0xff]   ;;  %v3407_v50 = vld [vmem:[#allocation5 + $0x5c0] ss:$16 sps:$4 sm:$0xff]  }
  0x81   :  { %1582 = vmatpush2.bf16.msra.mxu1 %v3329_v56  ;;  %1542 = vmatprep.subr.bf16.mxu0 %v3330_v57  ;;  %v3409_v47 = vld [vmem:[#allocation5 + $0x5c4] ss:$16 sps:$4 sm:$0xff]   ;;  %v3413_v55 = vld [vmem:[#allocation5 + $0x5a0] ss:$16 sps:$4 sm:$0xff]   ;;  %v3416_v56 = vld [vmem:[#allocation5 + $0xa8] ss:$16 sps:$4 sm:$0xff]  }
  0x82   :  { %1583 = vmatprep.subr.bf16.mxu1 %v3332_v58  ;;  %v3415_v53 = vld [vmem:[#allocation5 + $0x5a4] ss:$16 sps:$4 sm:$0xff]   ;;  %v3424_v58 = vld [vmem:[#allocation5 + $0x8c] ss:$16 sps:$4 sm:$0xff]  }
  0x83   :  { %v3421_v57 = vld [vmem:[#allocation5 + $0x584] ss:$16 sps:$4 sm:$0xff]  }
  0x84   :  { %1543 = vmatpush2.bf16.msra.mxu0 %v3334_v59  ;;  %v3419_v59 = vld [vmem:[#allocation5 + $0x580] ss:$16 sps:$4 sm:$0xff]  }
  0x85   :  { %1584 = vmatpush2.bf16.msra.mxu1 %v3335_v60  ;;  %1544 = vmatprep.subr.bf16.mxu0 %v3336_v61  ;;  %v3422_v60 = vld [vmem:[#allocation5 + $0x88] ss:$16 sps:$4 sm:$0xff]   ;;  %v3427_v61 = vld [vmem:[#allocation5 + $0x564] ss:$16 sps:$4 sm:$0xff]  }
  0x86   :  { %1585 = vmatprep.subr.bf16.mxu1 %v3338_v62  ;;  %v3430_v62 = vld [vmem:[#allocation5 + $0x6c] ss:$16 sps:$4 sm:$0xff]  }
  0x88   :  { %1545 = vmatpush2.bf16.msra.mxu0 %v3340_v63  ;;  %v3425_v63 = vld [vmem:[#allocation5 + $0x560] ss:$16 sps:$4 sm:$0xff]  }
  0x89   :  { %1586 = vmatpush2.bf16.msra.mxu1 %v3341_v0  ;;  %1546 = vmatprep.subr.bf16.mxu0 %v3342_v1  ;;  %v3433_v0 = vld [vmem:[#allocation5 + $0x544] ss:$16 sps:$4 sm:$0xff]   ;;  %v3436_v1 = vld [vmem:[#allocation5 + $0x4c] ss:$16 sps:$4 sm:$0xff]  }
  0x8a   :  { %1587 = vmatprep.subr.bf16.mxu1 %v3344_v2  ;;  %v3431_v2 = vld [vmem:[#allocation5 + $0x540] ss:$16 sps:$4 sm:$0xff]  }
  0x8c   :  { %1547 = vmatpush2.bf16.msra.mxu0 %v3346_v3  ;;  %v3434_v3 = vld [vmem:[#allocation5 + $0x48] ss:$16 sps:$4 sm:$0xff]  }
  0x8d   :  { %1588 = vmatpush2.bf16.msra.mxu1 %v3347_v4  ;;  %1598 = vmatprep.subr.bf16.mxu0 %v3354_v5  ;;  %v3439_v4 = vld [vmem:[#allocation5 + $0x524] ss:$16 sps:$4 sm:$0xff]   ;;  %v3442_v5 = vld [vmem:[#allocation5 + $0x2c] ss:$16 sps:$4 sm:$0xff]  }
  0x8e   :  { %1639 = vmatprep.subr.bf16.mxu1 %v3357_v6  ;;  %v3437_v6 = vld [vmem:[#allocation5 + $0x520] ss:$16 sps:$4 sm:$0xff]  }
  0x8f   :  { %1549 = vmatmul.mubr.bf16.vlgmr.msra.gmra.mxu0 %v3981_v7 }
  0x90   :  { %1590 = vmatmul.mubr.bf16.vlgmr.msra.gmra.mxu1 %v3983_v8  ;;  %1599 = vmatpush1.bf16.msra.mxu0 %v3352_v9  ;;  %v3440_v9 = vld [vmem:[#allocation5 + $0x28] ss:$16 sps:$4 sm:$0xff]  }
  0x91   :  { %1640 = vmatpush1.bf16.msra.mxu1 %v3355_v10  ;;  %1600 = vmatprep.subr.bf16.mxu0 %v3360_v11  ;;  %v3445_v10 = vld [vmem:[#allocation5 + $0x504] ss:$16 sps:$4 sm:$0xff]   ;;  %v3448_v11 = vld [vmem:[#allocation5 + $0xc] ss:$16 sps:$4 sm:$0xff]  }
  0x92   :  { %1641 = vmatprep.subr.bf16.mxu1 %v3363_v12  ;;  %1671 = vmatprep.mubr.bf16.mxu1 %v3881_v17  ;;  %v3443_v12 = vld [vmem:[#allocation5 + $0x500] ss:$16 sps:$4 sm:$0xff]  }
  0x93   :  { %1630 = vmatprep.mubr.bf16.mxu0 %v3992_v36 }
  0x94   :  { %1601 = vmatpush1.bf16.msra.mxu0 %v3358_v13  ;;  %v3446_v13 = vld [vmem:[#allocation5 + $0x8] ss:$16 sps:$4 sm:$0xff]  }
  0x95   :  { %1642 = vmatpush1.bf16.msra.mxu1 %v3361_v14  ;;  %1602 = vmatprep.subr.bf16.mxu0 %v3366_v15  ;;  %v3453_v14 = vld [vmem:[#allocation5 + $0x1ec] ss:$16 sps:$4 sm:$0xff]  }
  0x96   :  { %1643 = vmatprep.subr.bf16.mxu1 %v3369_v16  ;;  %v3456_v15 = vld [vmem:[#allocation5 + $0x2ec] ss:$16 sps:$4 sm:$0xff]   ;;  %v4001_v16 = vcombine.low %v3988_v34, %v3988_v34  ;;  %v3475_v34 = vld [vmem:[#allocation5 + $0x168] ss:$16 sps:$4 sm:$0xff]  }
  0x98   :  { %1603 = vmatpush1.bf16.msra.mxu0 %v3364_v18  ;;  %v3451_v18 = vld [vmem:[#allocation5 + $0x1e8] ss:$16 sps:$4 sm:$0xff]  }
  0x99   :  { %1644 = vmatpush1.bf16.msra.mxu1 %v3367_v19  ;;  %1604 = vmatprep.subr.bf16.mxu0 %v3372_v20  ;;  %v3454_v19 = vld [vmem:[#allocation5 + $0x2e8] ss:$16 sps:$4 sm:$0xff]   ;;  %v3459_v20 = vld [vmem:[#allocation5 + $0x1cc] ss:$16 sps:$4 sm:$0xff]  }
  0x9a   :  { %1645 = vmatprep.subr.bf16.mxu1 %v3375_v21  ;;  %v3462_v21 = vld [vmem:[#allocation5 + $0x2cc] ss:$16 sps:$4 sm:$0xff]  }
  0x9c   :  { %1605 = vmatpush1.bf16.msra.mxu0 %v3370_v22  ;;  %v3457_v22 = vld [vmem:[#allocation5 + $0x1c8] ss:$16 sps:$4 sm:$0xff]  }
  0x9d   :  { %1646 = vmatpush1.bf16.msra.mxu1 %v3373_v23  ;;  %1606 = vmatprep.subr.bf16.mxu0 %v3378_v24  ;;  %v3460_v23 = vld [vmem:[#allocation5 + $0x2c8] ss:$16 sps:$4 sm:$0xff]   ;;  %v3465_v24 = vld [vmem:[#allocation5 + $0x1ac] ss:$16 sps:$4 sm:$0xff]  }
  0x9e   :  { %1647 = vmatprep.subr.bf16.mxu1 %v3381_v25  ;;  %v3468_v25 = vld [vmem:[#allocation5 + $0x2ac] ss:$16 sps:$4 sm:$0xff]  }
  0xa0   :  { %1607 = vmatpush1.bf16.msra.mxu0 %v3376_v26  ;;  %v3463_v26 = vld [vmem:[#allocation5 + $0x1a8] ss:$16 sps:$4 sm:$0xff]  }
  0xa1   :  { %1648 = vmatpush1.bf16.msra.mxu1 %v3379_v27  ;;  %1608 = vmatprep.subr.bf16.mxu0 %v3384_v28  ;;  %v3466_v27 = vld [vmem:[#allocation5 + $0x2a8] ss:$16 sps:$4 sm:$0xff]   ;;  %v3471_v28 = vld [vmem:[#allocation5 + $0x18c] ss:$16 sps:$4 sm:$0xff]  }
  0xa2   :  { %1649 = vmatprep.subr.bf16.mxu1 %v3387_v29  ;;  %v3474_v29 = vld [vmem:[#allocation5 + $0x28c] ss:$16 sps:$4 sm:$0xff]  }
  0xa4   :  { %1609 = vmatpush1.bf16.msra.mxu0 %v3382_v30  ;;  %v3469_v30 = vld [vmem:[#allocation5 + $0x188] ss:$16 sps:$4 sm:$0xff]  }
  0xa5   :  { %1650 = vmatpush1.bf16.msra.mxu1 %v3385_v31  ;;  %1610 = vmatprep.subr.bf16.mxu0 %v3390_v32  ;;  %v3472_v31 = vld [vmem:[#allocation5 + $0x288] ss:$16 sps:$4 sm:$0xff]   ;;  %v3477_v32 = vld [vmem:[#allocation5 + $0x16c] ss:$16 sps:$4 sm:$0xff]  }
  0xa6   :  { %1651 = vmatprep.subr.bf16.mxu1 %v3393_v33  ;;  %v3480_v33 = vld [vmem:[#allocation5 + $0x26c] ss:$16 sps:$4 sm:$0xff]  }
  0xa8   :  { %1611 = vmatpush1.bf16.msra.mxu0 %v3388_v35  ;;  %v3483_v35 = vld [vmem:[#allocation5 + $0x14c] ss:$16 sps:$4 sm:$0xff]  }
  0xa9   :  { %1652 = vmatpush1.bf16.msra.mxu1 %v3391_v37  ;;  %1612 = vmatprep.subr.bf16.mxu0 %v3396_v38  ;;  %v3486_v37 = vld [vmem:[#allocation5 + $0x24c] ss:$16 sps:$4 sm:$0xff]   ;;  %v3481_v38 = vld [vmem:[#allocation5 + $0x148] ss:$16 sps:$4 sm:$0xff]  }
  0xaa   :  { %1653 = vmatprep.subr.bf16.mxu1 %v3399_v39  ;;  %v3484_v39 = vld [vmem:[#allocation5 + $0x248] ss:$16 sps:$4 sm:$0xff]  }
  0xac   :  { %1613 = vmatpush1.bf16.msra.mxu0 %v3394_v40  ;;  %v3489_v40 = vld [vmem:[#allocation5 + $0x12c] ss:$16 sps:$4 sm:$0xff]  }
  0xad   :  { %1654 = vmatpush1.bf16.msra.mxu1 %v3397_v41  ;;  %1614 = vmatprep.subr.bf16.mxu0 %v3402_v42  ;;  %v3492_v41 = vld [vmem:[#allocation5 + $0x22c] ss:$16 sps:$4 sm:$0xff]   ;;  %v3487_v42 = vld [vmem:[#allocation5 + $0x128] ss:$16 sps:$4 sm:$0xff]  }
  0xae   :  { %1680 = vmatprep.subr.bf16.mxu1 %v3406_v43  ;;  %v3490_v43 = vld [vmem:[#allocation5 + $0x228] ss:$16 sps:$4 sm:$0xff]  }
  0xb0   :  { %1672 = vmatmul.mubr.bf16.vlgmr.msra.gmra.mxu1 %v3995_v45  ;;  %1615 = vmatpush2.bf16.msra.mxu0 %v3400_v44  ;;  %v3495_v44 = vld [vmem:[#allocation5 + $0x10c] ss:$16 sps:$4 sm:$0xff]  }
  0xb1   :  { %1681 = vmatpush1.bf16.msra.mxu1 %v3404_v46  ;;  %1616 = vmatprep.subr.bf16.mxu0 %v3409_v47  ;;  %v3498_v46 = vld [vmem:[#allocation5 + $0x20c] ss:$16 sps:$4 sm:$0xff]   ;;  %v3493_v47 = vld [vmem:[#allocation5 + $0x108] ss:$16 sps:$4 sm:$0xff]  }
  0xb2   :  { %1682 = vmatprep.subr.bf16.mxu1 %v3412_v49  ;;  %1712 = vmatprep.mubr.bf16.mxu1 %v3975_v48  ;;  %v3428_v48 = vld [vmem:[#allocation5 + $0x68] ss:$16 sps:$4 sm:$0xff]  }
  0xb3   :  { %v3496_v49 = vld [vmem:[#allocation5 + $0x208] ss:$16 sps:$4 sm:$0xff]  }
  0xb4   :  { %1617 = vmatpush2.bf16.msra.mxu0 %v3407_v50  ;;  %v3501_v50 = vld [vmem:[#allocation5 + $0x3ec] ss:$16 sps:$4 sm:$0xff]  }
  0xb5   :  { %1683 = vmatpush1.bf16.msra.mxu1 %v3410_v51  ;;  %1618 = vmatprep.subr.bf16.mxu0 %v3415_v53  ;;  %v3504_v51 = vld [vmem:[#allocation5 + $0x4ec] ss:$16 sps:$4 sm:$0xff]   ;;  %v3499_v53 = vld [vmem:[#allocation5 + $0x3e8] ss:$16 sps:$4 sm:$0xff]  }
  0xb6   :  { %1684 = vmatprep.subr.bf16.mxu1 %v3418_v54  ;;  %v3502_v54 = vld [vmem:[#allocation5 + $0x4e8] ss:$16 sps:$4 sm:$0xff]  }
  0xb8   :  { %1619 = vmatpush2.bf16.msra.mxu0 %v3413_v55  ;;  %v3507_v55 = vld [vmem:[#allocation5 + $0x3cc] ss:$16 sps:$4 sm:$0xff]  }
  0xb9   :  { %1685 = vmatpush1.bf16.msra.mxu1 %v3416_v56  ;;  %1620 = vmatprep.subr.bf16.mxu0 %v3421_v57  ;;  %v3510_v56 = vld [vmem:[#allocation5 + $0x4cc] ss:$16 sps:$4 sm:$0xff]   ;;  %v3505_v57 = vld [vmem:[#allocation5 + $0x3c8] ss:$16 sps:$4 sm:$0xff]  }
  0xba   :  { %1686 = vmatprep.subr.bf16.mxu1 %v3424_v58  ;;  %v3508_v58 = vld [vmem:[#allocation5 + $0x4c8] ss:$16 sps:$4 sm:$0xff]  }
  0xbc   :  { %1621 = vmatpush2.bf16.msra.mxu0 %v3419_v59  ;;  %v3513_v59 = vld [vmem:[#allocation5 + $0x3ac] ss:$16 sps:$4 sm:$0xff]  }
  0xbd   :  { %1687 = vmatpush1.bf16.msra.mxu1 %v3422_v60  ;;  %1622 = vmatprep.subr.bf16.mxu0 %v3427_v61  ;;  %v3516_v60 = vld [vmem:[#allocation5 + $0x4ac] ss:$16 sps:$4 sm:$0xff]   ;;  %v3511_v61 = vld [vmem:[#allocation5 + $0x3a8] ss:$16 sps:$4 sm:$0xff]  }
  0xbe   :  { %1688 = vmatprep.subr.bf16.mxu1 %v3430_v62  ;;  %v3514_v62 = vld [vmem:[#allocation5 + $0x4a8] ss:$16 sps:$4 sm:$0xff]  }
  0xc0   :  { %1623 = vmatpush2.bf16.msra.mxu0 %v3425_v63  ;;  %v3519_v63 = vld [vmem:[#allocation5 + $0x38c] ss:$16 sps:$4 sm:$0xff]  }
  0xc1   :  { %1689 = vmatpush1.bf16.msra.mxu1 %v3428_v48  ;;  %1624 = vmatprep.subr.bf16.mxu0 %v3433_v0  ;;  %v3522_v48 = vld [vmem:[#allocation5 + $0x48c] ss:$16 sps:$4 sm:$0xff]   ;;  %v3517_v0 = vld [vmem:[#allocation5 + $0x388] ss:$16 sps:$4 sm:$0xff]  }
  0xc2   :  { %1690 = vmatprep.subr.bf16.mxu1 %v3436_v1  ;;  %v3525_v1 = vld [vmem:[#allocation5 + $0x36c] ss:$16 sps:$4 sm:$0xff]  }
  0xc4   :  { %1625 = vmatpush2.bf16.msra.mxu0 %v3431_v2  ;;  %v3528_v2 = vld [vmem:[#allocation5 + $0x46c] ss:$16 sps:$4 sm:$0xff]  }
  0xc5   :  { %1691 = vmatpush1.bf16.msra.mxu1 %v3434_v3  ;;  %1626 = vmatprep.subr.bf16.mxu0 %v3439_v4  ;;  %v3523_v3 = vld [vmem:[#allocation5 + $0x368] ss:$16 sps:$4 sm:$0xff]  }
  0xc6   :  { %1692 = vmatprep.subr.bf16.mxu1 %v3442_v5  ;;  %v3526_v4 = vld [vmem:[#allocation5 + $0x468] ss:$16 sps:$4 sm:$0xff]   ;;  %v3531_v5 = vld [vmem:[#allocation5 + $0x34c] ss:$16 sps:$4 sm:$0xff]  }
  0xc8   :  { %1627 = vmatpush2.bf16.msra.mxu0 %v3437_v6  ;;  %v3529_v6 = vld [vmem:[#allocation5 + $0x348] ss:$16 sps:$4 sm:$0xff]  }
  0xc9   :  { %1693 = vmatpush1.bf16.msra.mxu1 %v3440_v9  ;;  %1628 = vmatprep.subr.bf16.mxu0 %v3445_v10  ;;  %v3532_v9 = vld [vmem:[#allocation5 + $0x448] ss:$16 sps:$4 sm:$0xff]   ;;  %v3537_v10 = vld [vmem:[#allocation5 + $0x32c] ss:$16 sps:$4 sm:$0xff]  }
  0xca   :  { %1694 = vmatprep.subr.bf16.mxu1 %v3448_v11  ;;  %v3540_v11 = vld [vmem:[#allocation5 + $0x42c] ss:$16 sps:$4 sm:$0xff]  }
  0xcc   :  { %1629 = vmatpush2.bf16.msra.mxu0 %v3443_v12  ;;  %v3535_v12 = vld [vmem:[#allocation5 + $0x328] ss:$16 sps:$4 sm:$0xff]  }
  0xcd   :  { %1695 = vmatpush1.bf16.msra.mxu1 %v3446_v13  ;;  %1721 = vmatprep.subr.bf16.mxu0 %v3456_v15  ;;  %v3538_v13 = vld [vmem:[#allocation5 + $0x428] ss:$16 sps:$4 sm:$0xff]   ;;  %v3546_v15 = vld [vmem:[#allocation5 + $0x40c] ss:$16 sps:$4 sm:$0xff]  }
  0xce   :  { %1696 = vmatprep.subr.bf16.mxu1 %v3453_v14  ;;  %v3543_v14 = vld [vmem:[#allocation5 + $0x30c] ss:$16 sps:$4 sm:$0xff]  }
  0xcf   :  { %1631 = vmatmul.mubr.bf16.vlgmr.msra.gmra.mxu0 %v4001_v16 }
  0xd0   :  { %1722 = vmatpush1.bf16.msra.mxu0 %v3454_v19  ;;  %1753 = vmatprep.mubr.bf16.mxu0 %v3977_v52  ;;  %v3478_v52 = vld [vmem:[#allocation5 + $0x268] ss:$16 sps:$4 sm:$0xff]  }
  0xd1   :  { %1697 = vmatpush2.bf16.msra.mxu1 %v3451_v18  ;;  %1723 = vmatprep.subr.bf16.mxu0 %v3462_v21  ;;  %v3541_v18 = vld [vmem:[#allocation5 + $0x308] ss:$16 sps:$4 sm:$0xff]   ;;  %v3552_v21 = vld [vmem:[#allocation5 + $0x6ec] ss:$16 sps:$4 sm:$0xff]  }
  0xd2   :  { %1698 = vmatprep.subr.bf16.mxu1 %v3459_v20  ;;  %v3544_v19 = vld [vmem:[#allocation5 + $0x408] ss:$16 sps:$4 sm:$0xff]   ;;  %v3549_v20 = vld [vmem:[#allocation5 + $0x5ec] ss:$16 sps:$4 sm:$0xff]  }
  0xd4   :  { %1724 = vmatpush1.bf16.msra.mxu0 %v3460_v23  ;;  %v3550_v23 = vld [vmem:[#allocation5 + $0x6e8] ss:$16 sps:$4 sm:$0xff]  }
  0xd5   :  { %1699 = vmatpush2.bf16.msra.mxu1 %v3457_v22  ;;  %1725 = vmatprep.subr.bf16.mxu0 %v3468_v25  ;;  %v3547_v22 = vld [vmem:[#allocation5 + $0x5e8] ss:$16 sps:$4 sm:$0xff]   ;;  %v3558_v25 = vld [vmem:[#allocation5 + $0x6cc] ss:$16 sps:$4 sm:$0xff]  }
  0xd6   :  { %1700 = vmatprep.subr.bf16.mxu1 %v3465_v24  ;;  %v3555_v24 = vld [vmem:[#allocation5 + $0x5cc] ss:$16 sps:$4 sm:$0xff]  }
  0xd8   :  { %1726 = vmatpush1.bf16.msra.mxu0 %v3466_v27  ;;  %v3556_v27 = vld [vmem:[#allocation5 + $0x6c8] ss:$16 sps:$4 sm:$0xff]  }
  0xd9   :  { %1701 = vmatpush2.bf16.msra.mxu1 %v3463_v26  ;;  %1727 = vmatprep.subr.bf16.mxu0 %v3474_v29  ;;  %v3553_v26 = vld [vmem:[#allocation5 + $0x5c8] ss:$16 sps:$4 sm:$0xff]   ;;  %v3564_v29 = vld [vmem:[#allocation5 + $0x6ac] ss:$16 sps:$4 sm:$0xff]  }
  0xda   :  { %1702 = vmatprep.subr.bf16.mxu1 %v3471_v28  ;;  %v3561_v28 = vld [vmem:[#allocation5 + $0x5ac] ss:$16 sps:$4 sm:$0xff]  }
  0xdc   :  { %1728 = vmatpush1.bf16.msra.mxu0 %v3472_v31  ;;  %v3562_v31 = vld [vmem:[#allocation5 + $0x6a8] ss:$16 sps:$4 sm:$0xff]  }
  0xdd   :  { %1703 = vmatpush2.bf16.msra.mxu1 %v3469_v30  ;;  %1729 = vmatprep.subr.bf16.mxu0 %v3480_v33  ;;  %v3559_v30 = vld [vmem:[#allocation5 + $0x5a8] ss:$16 sps:$4 sm:$0xff]   ;;  %v3570_v33 = vld [vmem:[#allocation5 + $0x68c] ss:$16 sps:$4 sm:$0xff]  }
  0xde   :  { %1704 = vmatprep.subr.bf16.mxu1 %v3477_v32  ;;  %v3567_v32 = vld [vmem:[#allocation5 + $0x58c] ss:$16 sps:$4 sm:$0xff]  }
  0xe0   :  { %1730 = vmatpush1.bf16.msra.mxu0 %v3478_v52  ;;  %v3573_v52 = vld [vmem:[#allocation5 + $0x56c] ss:$16 sps:$4 sm:$0xff]  }
  0xe1   :  { %1705 = vmatpush2.bf16.msra.mxu1 %v3475_v34  ;;  %1731 = vmatprep.subr.bf16.mxu0 %v3486_v37  ;;  %v3565_v34 = vld [vmem:[#allocation5 + $0x588] ss:$16 sps:$4 sm:$0xff]  }
  0xe2   :  { %1706 = vmatprep.subr.bf16.mxu1 %v3483_v35  ;;  %v3576_v35 = vld [vmem:[#allocation5 + $0x66c] ss:$16 sps:$4 sm:$0xff]   ;;  %v3571_v37 = vld [vmem:[#allocation5 + $0x568] ss:$16 sps:$4 sm:$0xff]  }
  0xe4   :  { %1732 = vmatpush1.bf16.msra.mxu0 %v3484_v39  ;;  %v3582_v39 = vld [vmem:[#allocation5 + $0x64c] ss:$16 sps:$4 sm:$0xff]  }
  0xe5   :  { %1707 = vmatpush2.bf16.msra.mxu1 %v3481_v38  ;;  %1733 = vmatprep.subr.bf16.mxu0 %v3492_v41  ;;  %v3579_v38 = vld [vmem:[#allocation5 + $0x54c] ss:$16 sps:$4 sm:$0xff]   ;;  %v3580_v41 = vld [vmem:[#allocation5 + $0x648] ss:$16 sps:$4 sm:$0xff]  }
  0xe6   :  { %1708 = vmatprep.subr.bf16.mxu1 %v3489_v40  ;;  %v3577_v40 = vld [vmem:[#allocation5 + $0x548] ss:$16 sps:$4 sm:$0xff]  }
  0xe8   :  { %1734 = vmatpush1.bf16.msra.mxu0 %v3490_v43  ;;  %v3588_v43 = vld [vmem:[#allocation5 + $0x62c] ss:$16 sps:$4 sm:$0xff]  }
  0xe9   :  { %1709 = vmatpush2.bf16.msra.mxu1 %v3487_v42  ;;  %1735 = vmatprep.subr.bf16.mxu0 %v3498_v46  ;;  %v3585_v42 = vld [vmem:[#allocation5 + $0x52c] ss:$16 sps:$4 sm:$0xff]   ;;  %v3586_v46 = vld [vmem:[#allocation5 + $0x628] ss:$16 sps:$4 sm:$0xff]  }
  0xea   :  { %1710 = vmatprep.subr.bf16.mxu1 %v3495_v44  ;;  %v3583_v44 = vld [vmem:[#allocation5 + $0x528] ss:$16 sps:$4 sm:$0xff]  }
  0xec   :  { %1736 = vmatpush1.bf16.msra.mxu0 %v3496_v49  ;;  %v3594_v49 = vld [vmem:[#allocation5 + $0x60c] ss:$16 sps:$4 sm:$0xff]  }
  0xed   :  { %1711 = vmatpush2.bf16.msra.mxu1 %v3493_v47  ;;  %1737 = vmatprep.subr.bf16.mxu0 %v3501_v50  ;;  %v3591_v47 = vld [vmem:[#allocation5 + $0x50c] ss:$16 sps:$4 sm:$0xff]   ;;  %v3589_v50 = vld [vmem:[#allocation5 + $0x508] ss:$16 sps:$4 sm:$0xff]  }
  0xee   :  { %1762 = vmatprep.subr.bf16.mxu1 %v3504_v51  ;;  %v3592_v51 = vld [vmem:[#allocation5 + $0x608] ss:$16 sps:$4 sm:$0xff]  }
  0xf0   :  { %1713 = vmatmul.mubr.bf16.vlgmr.msra.gmra.mxu1 %v3981_v7  ;;  %1738 = vmatpush2.bf16.msra.mxu0 %v3499_v53  ;;  %v3520_v7 = vld [vmem:[#allocation5 + $0x488] ss:$16 sps:$4 sm:$0xff]  }
  0xf1   :  { %1763 = vmatpush1.bf16.msra.mxu1 %v3502_v54  ;;  %1739 = vmatprep.subr.bf16.mxu0 %v3507_v55  ;;  %v3597_v53 = vld [vmem:[#allocation8 + $0x74] ss:$8 sps:$4 sm:$0xff]   ;;  %v3595_v54 = vld [vmem:[#allocation8 + $0x70] ss:$8 sps:$4 sm:$0xff]   ;;  %v3600_v55 = vld [vmem:[#allocation8 + $0x64] ss:$8 sps:$4 sm:$0xff]  }
  0xf2   :  { %1764 = vmatprep.subr.bf16.mxu1 %v3510_v56  ;;  %1794 = vmatprep.mubr.bf16.mxu1 %v3992_v36  ;;  %v3534_v36 = vld [vmem:[#allocation5 + $0x44c] ss:$16 sps:$4 sm:$0xff]  }
  0xf3   :  { %v3598_v56 = vld [vmem:[#allocation8 + $0x60] ss:$8 sps:$4 sm:$0xff]  }
  0xf4   :  { %1740 = vmatpush2.bf16.msra.mxu0 %v3505_v57  ;;  %v3603_v57 = vld [vmem:[#allocation8 + $0x54] ss:$8 sps:$4 sm:$0xff]  }
  0xf5   :  { %1765 = vmatpush1.bf16.msra.mxu1 %v3508_v58  ;;  %1741 = vmatprep.subr.bf16.mxu0 %v3513_v59  ;;  %v3601_v58 = vld [vmem:[#allocation8 + $0x50] ss:$8 sps:$4 sm:$0xff]   ;;  %v3606_v59 = vld [vmem:[#allocation8 + $0x44] ss:$8 sps:$4 sm:$0xff]  }
  0xf6   :  { %1766 = vmatprep.subr.bf16.mxu1 %v3516_v60  ;;  %v3643_v60 = vld [vmem:[#allocation8 + $0x170] ss:$8 sps:$4 sm:$0xff]  }
  0xf8   :  { %1742 = vmatpush2.bf16.msra.mxu0 %v3511_v61  ;;  %v3645_v61 = vld [vmem:[#allocation8 + $0x174] ss:$8 sps:$4 sm:$0xff]  }
  0xf9   :  { %1767 = vmatpush1.bf16.msra.mxu1 %v3514_v62  ;;  %1743 = vmatprep.subr.bf16.mxu0 %v3519_v63  ;;  %v3604_v62 = vld [vmem:[#allocation8 + $0x40] ss:$8 sps:$4 sm:$0xff]   ;;  %v3609_v63 = vld [vmem:[#allocation8 + $0x34] ss:$8 sps:$4 sm:$0xff]  }
  0xfa   :  { %1768 = vmatprep.subr.bf16.mxu1 %v3522_v48  ;;  %v3610_v48 = vld [vmem:[#allocation8 + $0x20] ss:$8 sps:$4 sm:$0xff]  }
  0xfc   :  { %1744 = vmatpush2.bf16.msra.mxu0 %v3517_v0  ;;  %v3615_v0 = vld [vmem:[#allocation8 + $0x14] ss:$8 sps:$4 sm:$0xff]  }
  0xfd   :  { %1769 = vmatpush1.bf16.msra.mxu1 %v3520_v7  ;;  %1745 = vmatprep.subr.bf16.mxu0 %v3525_v1  ;;  %v3613_v7 = vld [vmem:[#allocation8 + $0x10] ss:$8 sps:$4 sm:$0xff]   ;;  %v3618_v1 = vld [vmem:[#allocation8 + $0x4] ss:$8 sps:$4 sm:$0xff]  }
  0xfe   :  { %1770 = vmatprep.subr.bf16.mxu1 %v3528_v2  ;;  %v3616_v2 = vld [vmem:[#allocation8] ss:$8 sps:$4 sm:$0xff]  }
 0x100   :  { %1746 = vmatpush2.bf16.msra.mxu0 %v3523_v3  ;;  %v3621_v3 = vld [vmem:[#allocation8 + $0xf4] ss:$8 sps:$4 sm:$0xff]  }
 0x101   :  { %1771 = vmatpush1.bf16.msra.mxu1 %v3526_v4  ;;  %1747 = vmatprep.subr.bf16.mxu0 %v3531_v5  ;;  %v3619_v4 = vld [vmem:[#allocation8 + $0xf0] ss:$8 sps:$4 sm:$0xff]   ;;  %v3624_v5 = vld [vmem:[#allocation8 + $0xe4] ss:$8 sps:$4 sm:$0xff]  }
 0x102   :  { %1772 = vmatprep.subr.bf16.mxu1 %v3534_v36 }
 0x104   :  { %1748 = vmatpush2.bf16.msra.mxu0 %v3529_v6 }
 0x105   :  { %1773 = vmatpush1.bf16.msra.mxu1 %v3532_v9  ;;  %1749 = vmatprep.subr.bf16.mxu0 %v3537_v10  ;;  %v3648_v9 = vld [vmem:[#allocation8 + $0x164] ss:$8 sps:$4 sm:$0xff]   ;;  %v3622_v10 = vld [vmem:[#allocation8 + $0xe0] ss:$8 sps:$4 sm:$0xff]  }
 0x106   :  { %1774 = vmatprep.subr.bf16.mxu1 %v3540_v11  ;;  %v3646_v11 = vld [vmem:[#allocation8 + $0x160] ss:$8 sps:$4 sm:$0xff]  }
 0x108   :  { %1750 = vmatpush2.bf16.msra.mxu0 %v3535_v12 }
 0x109   :  { %1775 = vmatpush1.bf16.msra.mxu1 %v3538_v13  ;;  %1751 = vmatprep.subr.bf16.mxu0 %v3543_v14  ;;  %v3627_v14 = vld [vmem:[#allocation8 + $0xd4] ss:$8 sps:$4 sm:$0xff]  }
 0x10a   :  { %1776 = vmatprep.subr.bf16.mxu1 %v3546_v15 }
 0x10c   :  { %1752 = vmatpush2.bf16.msra.mxu0 %v3541_v18 }
 0x10d   :  { %1777 = vmatpush1.bf16.msra.mxu1 %v3544_v19  ;;  %1803 = vmatprep.subr.bf16.mxu0 %v3552_v21  ;;  %v3651_v19 = vld [vmem:[#allocation8 + $0x154] ss:$8 sps:$4 sm:$0xff]   ;;  %v3649_v21 = vld [vmem:[#allocation8 + $0x150] ss:$8 sps:$4 sm:$0xff]  }
 0x10e   :  { %1778 = vmatprep.subr.bf16.mxu1 %v3549_v20  ;;  %v3625_v20 = vld [vmem:[#allocation8 + $0xd0] ss:$8 sps:$4 sm:$0xff]  }
 0x10f   :  { %1754 = vmatmul.mubr.bf16.vlgmr.msra.gmra.mxu0 %v3983_v8  ;;  %v3568_v8 = vld [vmem:[#allocation5 + $0x688] ss:$16 sps:$4 sm:$0xff]  }
 0x110   :  { %1804 = vmatpush1.bf16.msra.mxu0 %v3550_v23  ;;  %1835 = vmatprep.mubr.bf16.mxu0 %v3881_v17  ;;  %v3574_v17 = vld [vmem:[#allocation5 + $0x668] ss:$16 sps:$4 sm:$0xff]  }
 0x111   :  { %1779 = vmatpush2.bf16.msra.mxu1 %v3547_v22  ;;  %1805 = vmatprep.subr.bf16.mxu0 %v3558_v25  ;;  %v3654_v25 = vld [vmem:[#allocation8 + $0x144] ss:$8 sps:$4 sm:$0xff]  }
 0x112   :  { %1780 = vmatprep.subr.bf16.mxu1 %v3555_v24  ;;  %v3630_v24 = vld [vmem:[#allocation8 + $0xc4] ss:$8 sps:$4 sm:$0xff]  }
 0x114   :  { %1806 = vmatpush1.bf16.msra.mxu0 %v3556_v27  ;;  %v3657_v27 = vld [vmem:[#allocation8 + $0x134] ss:$8 sps:$4 sm:$0xff]  }
 0x115   :  { %1781 = vmatpush2.bf16.msra.mxu1 %v3553_v26  ;;  %1807 = vmatprep.subr.bf16.mxu0 %v3564_v29  ;;  %v3652_v26 = vld [vmem:[#allocation8 + $0x140] ss:$8 sps:$4 sm:$0xff]   ;;  %v3633_v29 = vld [vmem:[#allocation8 + $0xb4] ss:$8 sps:$4 sm:$0xff]  }
 0x116   :  { %1782 = vmatprep.subr.bf16.mxu1 %v3561_v28  ;;  %v3628_v28 = vld [vmem:[#allocation8 + $0xc0] ss:$8 sps:$4 sm:$0xff]  }
 0x118   :  { %1808 = vmatpush1.bf16.msra.mxu0 %v3562_v31  ;;  %v3660_v31 = vld [vmem:[#allocation8 + $0x124] ss:$8 sps:$4 sm:$0xff]  }
 0x119   :  { %1783 = vmatpush2.bf16.msra.mxu1 %v3559_v30  ;;  %1809 = vmatprep.subr.bf16.mxu0 %v3570_v33  ;;  %v3655_v30 = vld [vmem:[#allocation8 + $0x130] ss:$8 sps:$4 sm:$0xff]   ;;  %v3636_v33 = vld [vmem:[#allocation8 + $0xa4] ss:$8 sps:$4 sm:$0xff]  }
 0x11a   :  { %1784 = vmatprep.subr.bf16.mxu1 %v3567_v32  ;;  %v3631_v32 = vld [vmem:[#allocation8 + $0xb0] ss:$8 sps:$4 sm:$0xff]  }
 0x11c   :  { %1810 = vmatpush1.bf16.msra.mxu0 %v3568_v8  ;;  %v3663_v8 = vld [vmem:[#allocation8 + $0x114] ss:$8 sps:$4 sm:$0xff]  }
 0x11d   :  { %1785 = vmatpush2.bf16.msra.mxu1 %v3565_v34  ;;  %1811 = vmatprep.subr.bf16.mxu0 %v3576_v35  ;;  %v3658_v34 = vld [vmem:[#allocation8 + $0x120] ss:$8 sps:$4 sm:$0xff]   ;;  %v3639_v35 = vld [vmem:[#allocation8 + $0x94] ss:$8 sps:$4 sm:$0xff]  }
 0x11e   :  { %1786 = vmatprep.subr.bf16.mxu1 %v3573_v52  ;;  %v3634_v52 = vld [vmem:[#allocation8 + $0xa0] ss:$8 sps:$4 sm:$0xff]  }
 0x120   :  { %1812 = vmatpush1.bf16.msra.mxu0 %v3574_v17  ;;  %v3666_v17 = vld [vmem:[#allocation8 + $0x104] ss:$8 sps:$4 sm:$0xff]  }
 0x121   :  { %1787 = vmatpush2.bf16.msra.mxu1 %v3571_v37  ;;  %1813 = vmatprep.subr.bf16.mxu0 %v3582_v39  ;;  %v3661_v37 = vld [vmem:[#allocation8 + $0x110] ss:$8 sps:$4 sm:$0xff]   ;;  %v3642_v39 = vld [vmem:[#allocation8 + $0x84] ss:$8 sps:$4 sm:$0xff]  }
 0x122   :  { %1788 = vmatprep.subr.bf16.mxu1 %v3579_v38  ;;  %v3637_v38 = vld [vmem:[#allocation8 + $0x90] ss:$8 sps:$4 sm:$0xff]  }
 0x124   :  { %1814 = vmatpush1.bf16.msra.mxu0 %v3580_v41  ;;  %v3669_v41 = vld [vmem:[#allocation8 + $0x1f4] ss:$8 sps:$4 sm:$0xff]  }
 0x125   :  { %1789 = vmatpush2.bf16.msra.mxu1 %v3577_v40  ;;  %1815 = vmatprep.subr.bf16.mxu0 %v3588_v43  ;;  %v3664_v40 = vld [vmem:[#allocation8 + $0x100] ss:$8 sps:$4 sm:$0xff]   ;;  %v3667_v43 = vld [vmem:[#allocation8 + $0x1f0] ss:$8 sps:$4 sm:$0xff]  }
 0x126   :  { %1790 = vmatprep.subr.bf16.mxu1 %v3585_v42  ;;  %v3640_v42 = vld [vmem:[#allocation8 + $0x80] ss:$8 sps:$4 sm:$0xff]  }
 0x128   :  { %1816 = vmatpush1.bf16.msra.mxu0 %v3586_v46  ;;  %v3672_v46 = vld [vmem:[#allocation8 + $0x1e4] ss:$8 sps:$4 sm:$0xff]  }
 0x129   :  { %1791 = vmatpush2.bf16.msra.mxu1 %v3583_v44  ;;  %1817 = vmatprep.subr.bf16.mxu0 %v3594_v49 }
 0x12a   :  { %1792 = vmatprep.subr.bf16.mxu1 %v3591_v47  ;;  %v3670_v47 = vld [vmem:[#allocation8 + $0x1e0] ss:$8 sps:$4 sm:$0xff]  }
 0x12c   :  { %1818 = vmatpush1.bf16.msra.mxu0 %v3592_v51  ;;  %v3675_v51 = vld [vmem:[#allocation8 + $0x1d4] ss:$8 sps:$4 sm:$0xff]  }
 0x12d   :  { %1793 = vmatpush2.bf16.msra.mxu1 %v3589_v50  ;;  %2264 = vmatprep.subr.bf16.mxu0 %v3597_v53  ;;  %v3673_v53 = vld [vmem:[#allocation8 + $0x1d0] ss:$8 sps:$4 sm:$0xff]  }
 0x12e   :  { %2305 = vmatprep.subr.bf16.mxu1 %v3645_v61  ;;  %v3684_v61 = vld [vmem:[#allocation8 + $0x1a4] ss:$8 sps:$4 sm:$0xff]  }
 0x12f   :  { %1836 = vmatmul.mubr.bf16.vlgmr.msra.gmra.mxu0 %v3995_v45  ;;  %v3612_v45 = vld [vmem:[#allocation8 + $0x24] ss:$8 sps:$4 sm:$0xff]  }
 0x130   :  { %1795 = vmatmul.mubr.bf16.vlgmr.msra.gmra.mxu1 %v4001_v16  ;;  %2265 = vmatpush1.bf16.msra.mxu0 %v3595_v54  ;;  %v3607_v16 = vld [vmem:[#allocation8 + $0x30] ss:$8 sps:$4 sm:$0xff]  }
 0x131   :  { %2266 = vmatprep.subr.bf16.mxu0 %v3600_v55  ;;  %2306 = vmatpush1.bf16.msra.mxu1 %v3643_v60  ;;  %v3678_v55 = vld [vmem:[#allocation8 + $0x1c4] ss:$8 sps:$4 sm:$0xff]  }
 0x132   :  { %2307 = vmatprep.subr.bf16.mxu1 %v3648_v9 }
 0x134   :  { %2267 = vmatpush1.bf16.msra.mxu0 %v3598_v56  ;;  %v3676_v56 = vld [vmem:[#allocation8 + $0x1c0] ss:$8 sps:$4 sm:$0xff]  }
 0x135   :  { %2268 = vmatprep.subr.bf16.mxu0 %v3603_v57  ;;  %2308 = vmatpush1.bf16.msra.mxu1 %v3646_v11  ;;  %v351_v57 = vlaneseq }
 0x136   :  { %2309 = vmatprep.subr.bf16.mxu1 %v3651_v19 }
 0x137   :  { %v4019_v60 = vshrl.u32 %v351_v57, 7  ;;  %v3691_v57 = vld [vmem:[%s4161_s5 + $0x78] sm:$0xff]  }
 0x138   :  { %2269 = vmatpush1.bf16.msra.mxu0 %v3601_v58  ;;  %v3681_v58 = vld [vmem:[#allocation8 + $0x1b4] ss:$8 sps:$4 sm:$0xff]  }
 0x139   :  { %2270 = vmatprep.subr.bf16.mxu0 %v3606_v59  ;;  %2310 = vmatpush1.bf16.msra.mxu1 %v3649_v21  ;;  %v3679_v59 = vld [vmem:[#allocation8 + $0x1b0] ss:$8 sps:$4 sm:$0xff]  }
 0x13a   :  { %2311 = vmatprep.subr.bf16.mxu1 %v3654_v25 }
 0x13c   :  { %2271 = vmatpush1.bf16.msra.mxu0 %v3604_v62  ;;  %v3682_v62 = vld [vmem:[#allocation8 + $0x1a0] ss:$8 sps:$4 sm:$0xff]  }
 0x13d   :  { %2272 = vmatprep.subr.bf16.mxu0 %v3609_v63  ;;  %2312 = vmatpush1.bf16.msra.mxu1 %v3652_v26  ;;  %v353_v63 = vsub.s32 0, %v4019_v60 }
 0x13e   :  { %2313 = vmatprep.subr.bf16.mxu1 %v3657_v27 }
 0x140   :  { %2273 = vmatpush1.bf16.msra.mxu0 %v3607_v16  ;;  %v349_v16 = vld [vmem:[#allocation7] sm:$0xf] }
 0x141   :  { %2274 = vmatprep.subr.bf16.mxu0 %v3612_v45  ;;  %2314 = vmatpush1.bf16.msra.mxu1 %v3655_v30  ;;  %v3687_v45 = vld [vmem:[#allocation8 + $0x194] ss:$8 sps:$4 sm:$0xff]  }
 0x142   :  { %2315 = vmatprep.subr.bf16.mxu1 %v3660_v31 }
 0x144   :  { %2275 = vmatpush1.bf16.msra.mxu0 %v3610_v48  ;;  %v357_v48 = vsub.s32 1, %v4019_v60 }
 0x145   :  { %2276 = vmatprep.subr.bf16.mxu0 %v3615_v0  ;;  %2316 = vmatpush1.bf16.msra.mxu1 %v3658_v34  ;;  %v3685_v0 = vld [vmem:[#allocation8 + $0x190] ss:$8 sps:$4 sm:$0xff]  }
 0x146   :  { %2317 = vmatprep.subr.bf16.mxu1 %v3663_v8 }
 0x148   :  { %2277 = vmatpush1.bf16.msra.mxu0 %v3613_v7  ;;  %v354_v7 = vrot.slane %v349_v16, %v353_v63 }
 0x149   :  { %2278 = vmatprep.subr.bf16.mxu0 %v3618_v1  ;;  %2318 = vmatpush1.bf16.msra.mxu1 %v3661_v37  ;;  %v3690_v1 = vld [vmem:[#allocation8 + $0x184] ss:$8 sps:$4 sm:$0xff]  }
 0x14a   :  { %2319 = vmatprep.subr.bf16.mxu1 %v3666_v17  ;;  %v361_v17 = vsub.s32 2, %v4019_v60 }
 0x14c   :  { %2279 = vmatpush1.bf16.msra.mxu0 %v3616_v2  ;;  %v358_v2 = vrot.slane %v349_v16, %v357_v48 }
 0x14d   :  { %2280 = vmatprep.subr.bf16.mxu0 %v3621_v3  ;;  %2320 = vmatpush1.bf16.msra.mxu1 %v3664_v40  ;;  %v3688_v3 = vld [vmem:[#allocation8 + $0x180] ss:$8 sps:$4 sm:$0xff]  }
 0x14e   :  { %2321 = vmatprep.subr.bf16.mxu1 %v3669_v41 }
 0x14f   :  { %v4011_v36 = vpop.f32.mrf.mxu0 }
 0x150   :  { %v4013_v6 = vpop.f32.mrf.mxu1  ;;  %2281 = vmatpush2.bf16.msra.mxu0 %v3619_v4  ;;  %v1551_v4 = vadd.f32 %v4011_v36, %v354_v7 }
 0x151   :  { %v4015_v12 = vpop.f32.mrf.mxu0  ;;  %2282 = vmatprep.subr.bf16.mxu0 %v3624_v5  ;;  %2322 = vmatpush2.bf16.msra.mxu1 %v3667_v43 }
 0x152   :  { %v4017_v13 = vpop.f32.mrf.mxu1  ;;  %2323 = vmatprep.subr.bf16.mxu1 %v3672_v46  ;;  %v1553_v5 = vadd.f32 %v4015_v12, %v358_v2  ;;  %v1592_v9 = vadd.f32 %v4013_v6, %v1551_v4 }
 0x153   :  { %v1554_v15 = vpop.f32.mrf.mxu0 }
 0x154   :  { %v1595_v18 = vpop.f32.mrf.mxu1  ;;  %2283 = vmatpush2.bf16.msra.mxu0 %v3622_v10  ;;  %v1594_v11 = vadd.f32 %v4017_v13, %v1553_v5 }
 0x155   :  { %v1555_v22 = vpop.f32.mrf.mxu0  ;;  %2284 = vmatprep.subr.bf16.mxu0 %v3627_v14  ;;  %2324 = vmatpush2.bf16.msra.mxu1 %v3670_v47 }
 0x156   :  { %v1596_v23 = vpop.f32.mrf.mxu1  ;;  %2325 = vmatprep.subr.bf16.mxu1 %v3675_v51 }
 0x158   :  { %2285 = vmatpush2.bf16.msra.mxu0 %v3625_v20 }
 0x159   :  { %2286 = vmatprep.subr.bf16.mxu0 %v3630_v24  ;;  %2326 = vmatpush2.bf16.msra.mxu1 %v3673_v53 }
 0x15a   :  { %2327 = vmatprep.subr.bf16.mxu1 %v3678_v55 }
 0x15c   :  { %2287 = vmatpush2.bf16.msra.mxu0 %v3628_v28 }
 0x15d   :  { %2288 = vmatprep.subr.bf16.mxu0 %v3633_v29  ;;  %2328 = vmatpush2.bf16.msra.mxu1 %v3676_v56 }
 0x15e   :  { %2329 = vmatprep.subr.bf16.mxu1 %v3681_v58  ;;  %v3692_v58 = vld [vmem:[%s4161_s5 + $0x38] sm:$0xff]  }
 0x160   :  { %2289 = vmatpush2.bf16.msra.mxu0 %v3631_v32 }
 0x161   :  { %2290 = vmatprep.subr.bf16.mxu0 %v3636_v33  ;;  %2330 = vmatpush2.bf16.msra.mxu1 %v3679_v59 }
 0x162   :  { %2331 = vmatprep.subr.bf16.mxu1 %v3684_v61 }
 0x164   :  { %2291 = vmatpush2.bf16.msra.mxu0 %v3634_v52 }
 0x165   :  { %2292 = vmatprep.subr.bf16.mxu0 %v3639_v35  ;;  %2332 = vmatpush2.bf16.msra.mxu1 %v3682_v62 }
 0x166   :  { %2333 = vmatprep.subr.bf16.mxu1 %v3687_v45 }
 0x168   :  { %2293 = vmatpush2.bf16.msra.mxu0 %v3637_v38  ;;  %v365_v38 = vsub.s32 3, %v4019_v60 }
 0x169   :  { %2294 = vmatprep.subr.bf16.mxu0 %v3642_v39  ;;  %2334 = vmatpush2.bf16.msra.mxu1 %v3685_v0  ;;  %v362_v39 = vrot.slane %v349_v16, %v361_v17 }
 0x16a   :  { %2335 = vmatprep.subr.bf16.mxu1 %v3690_v1  ;;  %v366_v40 = vrot.slane %v349_v16, %v365_v38 }
 0x16c   :  { %2295 = vmatpush2.bf16.msra.mxu0 %v3640_v42 }
 0x16d   :  { %2336 = vmatpush2.bf16.msra.mxu1 %v3688_v3  ;;  %3160 = vmatprep.subr.bf16.mxu0 %v3691_v57  ;;  %v3712_v57 = vld [vmem:[%s4163_s7 + $0x10] sm:$0xff]  }
 0x170   :  { %v1673_v44 = vpop.f32.mrf.mxu1 }
 0x172   :  { %v1675_v49 = vpop.f32.mrf.mxu1 }
 0x174   :  { %v1677_v50 = vpop.f32.mrf.mxu1 }
 0x176   :  { %v1678_v54 = vpop.f32.mrf.mxu1 }
 0x18f   :  { %v1632_v10 = vpop.f32.mrf.mxu0 }
 0x190   :  { %v1633_v14 = vadd.f32 %v1632_v10, %v1592_v9 }
 0x191   :  { %v1634_v15 = vpop.f32.mrf.mxu0 }
 0x192   :  { %v1674_v18 = vadd.f32 %v1673_v44, %v1633_v14  ;;  %v1635_v19 = vadd.f32 %v1634_v15, %v1594_v11  ;;  %v3693_v14 = vld [vmem:[%s4161_s5 + $0x70] sm:$0xff]  }
 0x193   :  { %v1636_v20 = vpop.f32.mrf.mxu0  ;;  %v3694_v15 = vld [vmem:[%s4161_s5 + $0x30] sm:$0xff]  }
 0x194   :  { %v1848_v21 = vmul.f32 0.70710677, %v1674_v18  ;;  %v1676_v22 = vadd.f32 %v1675_v49, %v1635_v19  ;;  %v1844_v12 = vmul.f32 0.5, %v1674_v18  ;;  %v3695_v18 = vld [vmem:[%s4161_s5 + $0x68] sm:$0xff]   ;;  %v3697_v20 = vld [vmem:[%s4161_s5 + $0x60] sm:$0xff]  }
 0x195   :  { %v1637_v23 = vpop.f32.mrf.mxu0  ;;  %v3696_v19 = vld [vmem:[%s4161_s5 + $0x28] sm:$0xff]  }
 0x196   :  { %3721 = verf.f32 %v1848_v21  ;;  %v1849_v24 = vmul.f32 0.70710677, %v1676_v22  ;;  %v1845_v27 = vmul.f32 0.5, %v1676_v22  ;;  %v3698_v21 = vld [vmem:[%s4161_s5 + $0x20] sm:$0xff]   ;;  %v3699_v22 = vld [vmem:[%s4161_s5 + $0x58] sm:$0xff]  }
 0x197   :  { %v3700_v23 = vld [vmem:[%s4161_s5 + $0x18] sm:$0xff]  }
 0x198   :  { %3723 = verf.f32 %v1849_v24  ;;  %v3701_v24 = vld [vmem:[%s4161_s5 + $0x50] sm:$0xff]  }
 0x1a3   :  { %v3722_v36 = vpop.eup %3721 }
 0x1a4   :  { %v1856_v25 = vadd.f32 1.0, %v3722_v36  ;;  %v3702_v36 = vld [vmem:[%s4161_s5 + $0x10] sm:$0xff]  }
 0x1a5   :  { %v3724_v26 = vpop.eup %3723 }
 0x1a6   :  { %v1857_v6 = vadd.f32 1.0, %v3724_v26  ;;  %v1860_v28 = vmul.f32 %v1856_v25, %v1844_v12  ;;  %v3703_v25 = vld [vmem:[%s4161_s5 + $0x48] sm:$0xff]   ;;  %v3705_v12 = vld [vmem:[%s4161_s5 + $0x40] sm:$0xff]  }
 0x1a7   :  { %v3704_v26 = vld [vmem:[%s4161_s5 + $0x8] sm:$0xff]  }
 0x1a8   :  { %v1861_v29 = vmul.f32 %v1857_v6, %v1845_v27  ;;  %v1864_v30 = vpack.c.bf16 %v1860_v28, %v1860_v28  ;;  %v3706_v27 = vld [vmem:[%s4161_s5] sm:$0xff]   ;;  %v3707_v6 = vld [vmem:[%s4163_s7 + $0x38] sm:$0xff]   ;;  %v3882_v28 = vmov 0.0  }
 0x1a9   :  { %3199 = vmatprep.subr.bf16.mxu1 %v3882_v28 }
 0x1aa   :  { %v1865_v13 = vpack.c.bf16 %v1861_v29, %v1861_v29 }
 0x1ac   :  { %2296 = vmatprep.mubr.bf16.mxu0 %v1865_v13 }
 0x1ad   :  { %2297 = vmatmul.mubr.bf16.vlgmr.msra.gmra.mxu0 %v1864_v30 }
 0x1ae   :  { %3161 = vmatpush3.bf16.msra.mxu0 %v3692_v58  ;;  %v3713_v58 = vld [vmem:[%s4163_s7 + $0x8] sm:$0xff]  }
 0x1af   :  { %3162 = vmatprep.subr.bf16.mxu0 %v3693_v14  ;;  %v3716_v14 = vld [vmem:[%s4165_s9 + $0x10] sm:$0xff]  }
 0x1b0   :  { %v1714_v31 = vpop.f32.mrf.mxu1 }
 0x1b1   :  { %v1715_v41 = vadd.f32 %v1714_v31, %v362_v39 }
 0x1b2   :  { %v1716_v32 = vpop.f32.mrf.mxu1  ;;  %3163 = vmatpush3.bf16.msra.mxu0 %v3694_v15  ;;  %v3717_v15 = vld [vmem:[%s4165_s9 + $0x8] sm:$0xff]  }
 0x1b3   :  { %v1717_v42 = vadd.f32 %v1716_v32, %v366_v40  ;;  %3164 = vmatprep.subr.bf16.mxu0 %v3695_v18  ;;  %v1932_v32 = vld [vmem:[#allocation10] sm:$0x3] }
 0x1b4   :  { %v1718_v33 = vpop.f32.mrf.mxu1  ;;  %v3718_v18 = vld [vmem:[%s4165_s9] sm:$0xff]  }
 0x1b5   :  { %v1937_v33 = vrot.slane %v1932_v32, %v353_v63 }
 0x1b6   :  { %v1719_v34 = vpop.f32.mrf.mxu1  ;;  %3165 = vmatpush3.bf16.msra.mxu0 %v3696_v19  ;;  %v3140_v19 = vld [vmem:[#allocation11] ss:$0 sm:$0xff] }
 0x1b7   :  { %3166 = vmatprep.subr.bf16.mxu0 %v3697_v20  ;;  %v1941_v34 = vrot.slane %v1932_v32, %v357_v48 }
 0x1ba   :  { %3167 = vmatpush3.bf16.msra.mxu0 %v3698_v21 }
 0x1bb   :  { %3168 = vmatprep.subr.bf16.mxu0 %v3699_v22 }
 0x1be   :  { %3169 = vmatpush3.bf16.msra.mxu0 %v3700_v23 }
 0x1bf   :  { %3170 = vmatprep.subr.bf16.mxu0 %v3701_v24 }
 0x1c2   :  { %3171 = vmatpush3.bf16.msra.mxu0 %v3702_v36 }
 0x1c3   :  { %3172 = vmatprep.subr.bf16.mxu0 %v3703_v25 }
 0x1c6   :  { %3173 = vmatpush3.bf16.msra.mxu0 %v3704_v26 }
 0x1c7   :  { %3174 = vmatprep.subr.bf16.mxu0 %v3705_v12 }
 0x1ca   :  { %3175 = vmatpush3.bf16.msra.mxu0 %v3706_v27 }
 0x1cb   :  { %3219 = vmatprep.subr.bf16.mxu0 %v3882_v28 }
 0x1cf   :  { %v1755_v8 = vpop.f32.mrf.mxu0 }
 0x1d0   :  { %v1756_v43 = vadd.f32 %v1755_v8, %v1715_v41 }
 0x1d1   :  { %v1757_v52 = vpop.f32.mrf.mxu0 }
 0x1d2   :  { %v1758_v47 = vadd.f32 %v1757_v52, %v1717_v42 }
 0x1d3   :  { %v1759_v35 = vpop.f32.mrf.mxu0 }
 0x1d5   :  { %v1760_v37 = vpop.f32.mrf.mxu0 }
 0x1ef   :  { %v1837_v46 = vpop.f32.mrf.mxu0 }
 0x1f0   :  { %v1796_v44 = vpop.f32.mrf.mxu1 }
 0x1f1   :  { %v1797_v49 = vadd.f32 %v1796_v44, %v1756_v43  ;;  %v1839_v51 = vpop.f32.mrf.mxu0 }
 0x1f2   :  { %v1798_v50 = vpop.f32.mrf.mxu1 }
 0x1f3   :  { %v1838_v53 = vadd.f32 %v1837_v46, %v1797_v49  ;;  %v1799_v54 = vadd.f32 %v1798_v50, %v1758_v47  ;;  %v1841_v56 = vpop.f32.mrf.mxu0 }
 0x1f4   :  { %v1800_v55 = vpop.f32.mrf.mxu1  ;;  %v3711_v56 = vld [vmem:[%s4163_s7 + $0x18] sm:$0xff]  }
 0x1f5   :  { %v1850_v59 = vmul.f32 0.70710677, %v1838_v53  ;;  %v1840_v61 = vadd.f32 %v1839_v51, %v1799_v54  ;;  %v1842_v16 = vpop.f32.mrf.mxu0  ;;  %v1846_v2 = vmul.f32 0.5, %v1838_v53  ;;  %v3708_v53 = vld [vmem:[%s4163_s7 + $0x30] sm:$0xff]   ;;  %v3709_v54 = vld [vmem:[%s4163_s7 + $0x28] sm:$0xff]   ;;  %v3710_v55 = vld [vmem:[%s4163_s7 + $0x20] sm:$0xff]  }
 0x1f6   :  { %v1801_v62 = vpop.f32.mrf.mxu1 }
 0x1f7   :  { %3725 = verf.f32 %v1850_v59  ;;  %v1851_v45 = vmul.f32 0.70710677, %v1840_v61  ;;  %v1847_v3 = vmul.f32 0.5, %v1840_v61  ;;  %v3714_v59 = vld [vmem:[%s4163_s7] sm:$0xff]  }
 0x1f8   :  { %v3123_v62 = vld [vmem:[%s4162_s6] ss:$0 sm:$0xff] }
 0x1f9   :  { %3727 = verf.f32 %v1851_v45 }
 0x204   :  { %v3726_v0 = vpop.eup %3725 }
 0x205   :  { %v1858_v7 = vadd.f32 1.0, %v3726_v0 }
 0x206   :  { %v3728_v1 = vpop.eup %3727 }
 0x207   :  { %v1859_v4 = vadd.f32 1.0, %v3728_v1  ;;  %v1862_v5 = vmul.f32 %v1858_v7, %v1846_v2 }
 0x209   :  { %v1863_v9 = vmul.f32 %v1859_v4, %v1847_v3  ;;  %v1866_v11 = vpack.c.bf16 %v1862_v5, %v1862_v5 }
 0x20b   :  { %v1867_v10 = vpack.c.bf16 %v1863_v9, %v1863_v9 }
 0x20d   :  { %2337 = vmatprep.mubr.bf16.mxu1 %v1867_v10 }
 0x20e   :  { %2338 = vmatmul.mubr.bf16.vlgmr.msra.gmra.mxu1 %v1866_v11  ;;  %v3715_v11 = vld [vmem:[%s4165_s9 + $0x18] sm:$0xff]  }
 0x20f   :  { %3200 = vmatpush3.bf16.msra.mxu1 %v3707_v6  ;;  %3215 = vmatprep.mubr.msk.bf16.mxu1 %vm3883_vm0, %v3882_v28 }
 0x210   :  { %3201 = vmatprep.subr.bf16.mxu1 %v3882_v28 }
 0x213   :  { %3202 = vmatpush3.bf16.msra.mxu1 %v3708_v53 }
 0x214   :  { %3203 = vmatprep.subr.bf16.mxu1 %v3882_v28 }
 0x217   :  { %3204 = vmatpush3.bf16.msra.mxu1 %v3709_v54 }
 0x218   :  { %3205 = vmatprep.subr.bf16.mxu1 %v3882_v28 }
 0x21b   :  { %3206 = vmatpush3.bf16.msra.mxu1 %v3710_v55 }
 0x21c   :  { %3207 = vmatprep.subr.bf16.mxu1 %v3882_v28 }
 0x21f   :  { %3208 = vmatpush3.bf16.msra.mxu1 %v3711_v56 }
 0x220   :  { %3209 = vmatprep.subr.bf16.mxu1 %v3882_v28 }
 0x223   :  { %3210 = vmatpush3.bf16.msra.mxu1 %v3712_v57 }
 0x224   :  { %3211 = vmatprep.subr.bf16.mxu1 %v3882_v28 }
 0x227   :  { %3212 = vmatpush3.bf16.msra.mxu1 %v3713_v58 }
 0x228   :  { %3213 = vmatprep.subr.bf16.mxu1 %v3882_v28 }
 0x22b   :  { %3214 = vmatpush3.bf16.msra.mxu1 %v3714_v59 }
 0x22c   :  { %3231 = vmatprep.subr.bf16.mxu1 %v3882_v28 }
 0x26d   :  { %v2298_v29 = vpop.f32.mrf.mxu0 }
 0x26e   :  { %v2299_v8 = vadd.f32 %v2298_v29, %v1937_v33  ;;  %v3719_v29 = vld [vmem:[%s4167_s11 + $0x8] sm:$0xff]  }
 0x26f   :  { %v2300_v13 = vpop.f32.mrf.mxu0 }
 0x270   :  { %v2301_v35 = vadd.f32 %v2300_v13, %v1941_v34  ;;  %v3720_v13 = vld [vmem:[%s4167_s11] sm:$0xff]  }
 0x271   :  { %v2302_v30 = vpop.f32.mrf.mxu0 }
 0x272   :  { %v3149_v30 = vld [vmem:[%s4166_s10] ss:$0 sm:$0xff] }
 0x273   :  { %v2303_v31 = vpop.f32.mrf.mxu0 }
 0x2ce   :  { %v2339_v52 = vpop.f32.mrf.mxu1 }
 0x2cf   :  { %v2340_v37 = vadd.f32 %v2339_v52, %v2299_v8 }
 0x2d0   :  { %v2341_v17 = vpop.f32.mrf.mxu1 }
 0x2d1   :  { %v2348_v38 = vmul.f32 0.70710677, %v2340_v37  ;;  %v2342_v39 = vadd.f32 %v2341_v17, %v2301_v35  ;;  %v2346_v47 = vmul.f32 0.5, %v2340_v37 }
 0x2d2   :  { %v2343_v40 = vpop.f32.mrf.mxu1 }
 0x2d3   :  { %3729 = verf.f32 %v2348_v38  ;;  %v2349_v41 = vmul.f32 0.70710677, %v2342_v39  ;;  %v2347_v63 = vmul.f32 0.5, %v2342_v39  ;;  %v3155_v39 = vld [vmem:[#allocation2] ss:$0 sm:$0xff] }
 0x2d4   :  { %v2344_v42 = vpop.f32.mrf.mxu1 }
 0x2d5   :  { %3731 = verf.f32 %v2349_v41 }
 0x2e0   :  { %v3730_v43 = vpop.eup %3729 }
 0x2e1   :  { %v2352_v44 = vadd.f32 1.0, %v3730_v43 }
 0x2e2   :  { %v3732_v46 = vpop.eup %3731 }
 0x2e3   :  { %v2353_v49 = vadd.f32 1.0, %v3732_v46  ;;  %v2354_v60 = vmul.f32 %v2352_v44, %v2346_v47 }
 0x2e5   :  { %v2355_v48 = vmul.f32 %v2353_v49, %v2347_v63  ;;  %v2356_v51 = vpack.c.bf16 %v2354_v60, %v2354_v60 }
 0x2e7   :  { %v2357_v50 = vpack.c.bf16 %v2355_v48, %v2355_v48 }
 0x2e9   :  { %2525 = vmatprep.mubr.bf16.mxu0 %v2357_v50 }
 0x2ea   :  { %2526 = vmatmul.mubr.bf16.vlgmr.msra.gmra.mxu0 %v2356_v51 }
 0x2eb   :  { %3227 = vmatprep.mubr.msk.bf16.mxu0 %vm3883_vm0, %v3882_v28  ;;  %3220 = vmatpush3.bf16.msra.mxu0 %v3715_v11 }
 0x2ec   :  { %3221 = vmatprep.subr.bf16.mxu0 %v3882_v28 }
 0x2ef   :  { %3222 = vmatpush3.bf16.msra.mxu0 %v3716_v14 }
 0x2f0   :  { %3223 = vmatprep.subr.bf16.mxu0 %v3882_v28 }
 0x2f3   :  { %3224 = vmatpush3.bf16.msra.mxu0 %v3717_v15 }
 0x2f4   :  { %3225 = vmatprep.subr.bf16.mxu0 %v3882_v28 }
 0x2f7   :  { %3226 = vmatpush3.bf16.msra.mxu0 %v3718_v18 }
 0x3aa   :  { %v3176_v61 = vpop.f32.mrf.mxu0 }
 0x3ac   :  { %v3177_v16 = vpop.f32.mrf.mxu0 }
 0x3ad   :  { %v3178_v45 = vadd.f32 %v3177_v16, %v3176_v61 }
 0x3ae   :  { %v3179_v0 = vpop.f32.mrf.mxu0 }
 0x3af   :  { %v2528_v7 = vadd.f32 %v3178_v45, %v3123_v62 }
 0x3b0   :  { %v3180_v1 = vpop.f32.mrf.mxu0 }
 0x3b1   :  { %v2534_v2 = vmul.f32 0.70710677, %v2528_v7  ;;  %v2533_v4 = vmul.f32 0.5, %v2528_v7 }
 0x3b3   :  { %3733 = verf.f32 %v2534_v2 }
 0x3c0   :  { %v3734_v3 = vpop.eup %3733 }
 0x3c1   :  { %v2536_v5 = vadd.f32 1.0, %v3734_v3 }
 0x3c3   :  { %v2537_v9 = vmul.f32 %v2536_v5, %v2533_v4 }
 0x3c5   :  { %v2538_v10 = vpack.c.bf16 %v2537_v9, %v2537_v9 }
 0x3c7   :  { %3216 = vmatmul.mubr.bf16.vlgmr.msra.gmra.mxu1 %v2538_v10 }
 0x3c8   :  { %3235 = vmatprep.mubr.msk.bf16.mxu1 %vm3883_vm0, %v3882_v28  ;;  %3232 = vmatpush3.bf16.msra.mxu1 %v3719_v29 }
 0x3c9   :  { %3233 = vmatprep.subr.bf16.mxu1 %v3882_v28 }
 0x3cc   :  { %3234 = vmatpush3.bf16.msra.mxu1 %v3720_v13 }
 0x487   :  { %v2644_v20 = vpop.f32.mrf.mxu1 }
 0x488   :  { %v2645_v21 = vadd.f32 %v3140_v19, %v2644_v20 }
 0x489   :  { %v3217_v22 = vpop.f32.mrf.mxu1 }
 0x48a   :  { %v2651_v23 = vmul.f32 0.70710677, %v2645_v21  ;;  %v2650_v26 = vmul.f32 0.5, %v2645_v21 }
 0x48b   :  { %v2647_v24 = vpop.f32.mrf.mxu1 }
 0x48c   :  { %3735 = verf.f32 %v2651_v23 }
 0x48d   :  { %v3218_v36 = vpop.f32.mrf.mxu1 }
 0x499   :  { %v3736_v25 = vpop.eup %3735 }
 0x49a   :  { %v2653_v12 = vadd.f32 1.0, %v3736_v25 }
 0x49c   :  { %v2654_v27 = vmul.f32 %v2653_v12, %v2650_v26 }
 0x49e   :  { %v2655_v6 = vpack.c.bf16 %v2654_v27, %v2654_v27 }
 0x4a0   :  { %3228 = vmatmul.mubr.msk.bf16.vlgmr.msra.gmra.mxu0 %vm2695_vm1, %v2655_v6 }
 0x560   :  { %v2733_v31 = vpop.f32.mrf.mxu0 }
 0x561   :  { %v2734_v32 = vadd.f32 %v3149_v30, %v2733_v31 }
 0x562   :  { %v3229_v33 = vpop.f32.mrf.mxu0 }
 0x563   :  { %v2740_v34 = vmul.f32 0.70710677, %v2734_v32  ;;  %v2739_v37 = vmul.f32 0.5, %v2734_v32 }
 0x564   :  { %v2736_v8 = vpop.f32.mrf.mxu0 }
 0x565   :  { %3737 = verf.f32 %v2740_v34 }
 0x566   :  { %v3230_v52 = vpop.f32.mrf.mxu0 }
 0x572   :  { %v3738_v35 = vpop.eup %3737 }
 0x573   :  { %v2742_v17 = vadd.f32 1.0, %v3738_v35 }
 0x575   :  { %v2743_v28 = vmul.f32 %v2742_v17, %v2739_v37 }
 0x577   :  { %v2744_v38 = vpack.c.bf16 %v2743_v28, %v2743_v28 }
 0x579   :  { %3236 = vmatmul.mubr.msk.bf16.vlgmr.msra.gmra.mxu1 %vm2768_vm2, %v2744_v38 }
 0x639   :  { %v2806_v40 = vpop.f32.mrf.mxu1 }
 0x63a   :  { %v2807_v41 = vadd.f32 %v3155_v39, %v2806_v40 }
 0x63b   :  { %v3237_v42 = vpop.f32.mrf.mxu1 }
 0x63c   :  { %v3159_v43 = vmul.f32 -1.442695, %v2807_v41 }
 0x63d   :  { %v2809_v44 = vpop.f32.mrf.mxu1 }
 0x63e   :  { %3739 = vpow2.f32 %v3159_v43 }
 0x63f   :  { %v3238_v46 = vpop.f32.mrf.mxu1 }
 0x64b   :  { %v3740_v47 = vpop.eup %3739 }
 0x64c   :  { %v2815_v63 = vadd.f32 1.0, %v3740_v47 }
 0x64e   :  { %3741 = vrcp.f32 %v2815_v63 }
 0x65b   :  { %v3742_v49 = vpop.eup %3741 }
 0x65c   :  { %2819 = vst.msk [vmem:[%s4169_s13] sm:$0xff] %vm2818_vm3, %v3742_v49 }
 0x65d   :  { %2824 = vsyncpa [#allocation4], 1 }
 0x65e   :  { %2825 = vsyncpa [#allocation6], 1 }
 0x65f   :  { %2826 = vsyncpa [#allocation9], 1 }
 0x660   :  { %2827 = vsyncpa [#allocation12], 1 }

</bundles_post_ra>
